<compile_context>
chip_gen: v5e
topology: v5e:2x2
jax: 0.10.0
libtpu: 0.0.40
codegen_flags: <defaults>
</compile_context>

<pallas_src>
import functools

import jax
import jax.numpy as jnp
from jax.experimental import pallas as pl
from jax.experimental.pallas import tpu as pltpu  # noqa: F401  (TPU backend)


# -----------------------------------------------------------------------------
# MLP tail shared by trunk / branch:
#   [Linear, Tanh] * L -> Linear (no tanh) -> Linear (out layer)
# (mirrors hid_layers_* -> out_layer_* of the PyTorch module)
# -----------------------------------------------------------------------------
def _mlp_tail(h, w_hid_ref, b_hid_ref, w_out_ref, b_out_ref, n_tanh):
    for l in range(n_tanh):
        h = jnp.tanh(
            jnp.dot(h, w_hid_ref[l], preferred_element_type=jnp.float32)
            + b_hid_ref[l]
        )
    # trailing plain Linear of hid_layers_*
    h = (
        jnp.dot(h, w_hid_ref[n_tanh], preferred_element_type=jnp.float32)
        + b_hid_ref[n_tanh]
    )
    # out_layer_*
    return (
        jnp.dot(h, w_out_ref[...], preferred_element_type=jnp.float32)
        + b_out_ref[...]
    )


# -----------------------------------------------------------------------------
# Single fused Pallas kernel: branch MLP + trunk MLP + DeepONet contraction
# -----------------------------------------------------------------------------
def _deeponet_kernel(
    trunk_x_ref, branch_x_ref,
    t_win_ref, t_bin_ref, t_whid_ref, t_bhid_ref, t_wout_ref, t_bout_ref,
    b_win_ref, b_bin_ref, b_whid_ref, b_bhid_ref, b_wout_ref, b_bout_ref,
    o_ref, *, n_layers_trunk, n_layers_branch,
):
    # ---- branch net: (1, P) -> (1, nmax)  (tiny; computed once per call) ----
    branch_h = (
        jnp.dot(branch_x_ref[...], b_win_ref[...],
                preferred_element_type=jnp.float32)
        + b_bin_ref[...]
    )
    branch = _mlp_tail(branch_h, b_whid_ref, b_bhid_ref, b_wout_ref,
                       b_bout_ref, n_layers_branch)

    # ---- trunk net: (N, 3) -> (N, nmax) ----
    x = trunk_x_ref[...]            # (N, 3)
    w_in = t_win_ref[...]           # (3, H)
    # K = 3 first layer as VPU broadcast FMAs (avoids a padded K=3 MXU matmul)
    h = (
        x[:, 0:1] * w_in[0:1, :]
        + x[:, 1:2] * w_in[1:2, :]
        + x[:, 2:3] * w_in[2:3, :]
        + t_bin_ref[...]
    )
    trunk = _mlp_tail(h, t_whid_ref, t_bhid_ref, t_wout_ref, t_bout_ref,
                      n_layers_trunk)  # (N, nmax)

    # ---- DeepONet contraction as a transposed MXU matmul ----
    # out[0, n] = sum_k branch[0, k] * trunk[n, k]   -> lane-dense (1, N)
    o_ref[...] = jax.lax.dot_general(
        branch, trunk,
        dimension_numbers=(((1,), (1,)), ((), ())),
        preferred_element_type=jnp.float32,
    )


# -----------------------------------------------------------------------------
# Wrapper: one pallas_call, no grid (whole problem fits in VMEM)
# -----------------------------------------------------------------------------
def deeponet_forward(domainPoints, timePoints, parabBDFunction,
                     parabBDPointsSpace, parabBDPointsTime,
                     trunk_params, branch_params,
                     n_layers_trunk, n_layers_branch):
    # trunk = cat((x0, x1, t), dim=1)
    trunk_in = jnp.concatenate(
        [domainPoints[0], domainPoints[1], timePoints], axis=1
    ).astype(jnp.float32)                                   # (N, 3)
    # branch = parabBDFunction(space, time).view(1, -1)
    branch_in = parabBDFunction(parabBDPointsSpace, parabBDPointsTime)
    branch_in = branch_in.reshape(1, -1).astype(jnp.float32)  # (1, P)

    N = trunk_in.shape[0]
    kernel = functools.partial(
        _deeponet_kernel,
        n_layers_trunk=n_layers_trunk,
        n_layers_branch=n_layers_branch,
    )
    out_row = pl.pallas_call(
        kernel,
        out_shape=jax.ShapeDtypeStruct((1, N), jnp.float32),
    )(trunk_in, branch_in, *trunk_params, *branch_params)

    # lane-dense (1, N) inside the kernel; present (N, 1) to match the module
    return out_row.reshape(N, 1)


# -----------------------------------------------------------------------------
# Deterministic parameter construction (PyTorch nn.Linear-style uniform init)
# -----------------------------------------------------------------------------
def _init_linear(key, fan_in, fan_out):
    k1, k2 = jax.random.split(key)
    bound = 1.0 / float(fan_in) ** 0.5
    w = jax.random.uniform(k1, (fan_in, fan_out), jnp.float32, -bound, bound)
    b = jax.random.uniform(k2, (1, fan_out), jnp.float32, -bound, bound)
    return w, b


def _init_subnet(key, in_dim, hidden, n_layers, nmax):
    keys = jax.random.split(key, n_layers + 3)
    w_in, b_in = _init_linear(keys[0], in_dim, hidden)
    ws, bs = [], []
    for l in range(n_layers + 1):  # n_layers tanh blocks + final plain Linear
        w, b = _init_linear(keys[1 + l], hidden, hidden)
        ws.append(w)
        bs.append(b)
    w_hid = jnp.stack(ws, axis=0)          # (L+1, H, H)
    b_hid = jnp.stack(bs, axis=0)          # (L+1, 1, H)
    w_out, b_out = _init_linear(keys[-1], hidden, nmax)
    return (w_in, b_in, w_hid, b_hid, w_out, b_out)


# -----------------------------------------------------------------------------
# Pure-JAX reference (same math, no Pallas) for a correctness check
# -----------------------------------------------------------------------------
def _ref_mlp(x, w_in, b_in, w_hid, b_hid, w_out, b_out, n_tanh):
    hp = jax.lax.Precision.HIGHEST
    h = jnp.dot(x, w_in, precision=hp) + b_in
    for l in range(n_tanh):
        h = jnp.tanh(jnp.dot(h, w_hid[l], precision=hp) + b_hid[l])
    h = jnp.dot(h, w_hid[n_tanh], precision=hp) + b_hid[n_tanh]
    return jnp.dot(h, w_out, precision=hp) + b_out


def _reference(domainPoints, timePoints, parabBDFunction,
               parabBDPointsSpace, parabBDPointsTime,
               trunk_params, branch_params, n_layers_trunk, n_layers_branch):
    trunk_in = jnp.concatenate(
        [domainPoints[0], domainPoints[1], timePoints], axis=1
    )
    branch_in = parabBDFunction(parabBDPointsSpace, parabBDPointsTime)
    branch_in = branch_in.reshape(1, -1)
    trunk = _ref_mlp(trunk_in, *trunk_params, n_layers_trunk)
    branch = _ref_mlp(branch_in, *branch_params, n_layers_branch)
    return jnp.sum(trunk * branch, axis=1, keepdims=True)


if __name__ == "__main__":
    key = jax.random.PRNGKey(0)

    # Hyper-parameters (small, consistent with the module's __init__)
    n_hidden_trunk = 32
    n_layers_trunk = 2
    n_hidden_branch = 32
    n_layers_branch = 2
    nmax = max(n_hidden_trunk, n_hidden_branch)
    nParabBDPoints = 16            # boundary sensor points
    N = 256                        # number of (space, time) query points

    (k_pts, k_sp0, k_sp1, k_tm, k_d0, k_d1, k_dt,
     k_trunk, k_branch) = jax.random.split(key, 9)

    # Parabolic boundary sensor locations (fixed at construction time)
    parabBDPointsSpace = [
        jax.random.uniform(k_sp0, (nParabBDPoints, 1), jnp.float32),
        jax.random.uniform(k_sp1, (nParabBDPoints, 1), jnp.float32),
    ]
    parabBDPointsTime = jax.random.uniform(k_tm, (nParabBDPoints, 1),
                                           jnp.float32)

    # Boundary data function (the callable passed to forward)
    def parabBDFunction(space, time):
        return jnp.sin(space[0]) * jnp.cos(space[1]) * jnp.exp(-time)

    # Query points for the trunk network
    domainPoints = [
        jax.random.uniform(k_d0, (N, 1), jnp.float32),
        jax.random.uniform(k_d1, (N, 1), jnp.float32),
    ]
    timePoints = jax.random.uniform(k_dt, (N, 1), jnp.float32)

    # Deterministic parameters
    trunk_params = _init_subnet(k_trunk, 3, n_hidden_trunk,
                                n_layers_trunk, nmax)
    branch_params = _init_subnet(k_branch, nParabBDPoints, n_hidden_branch,
                                 n_layers_branch, nmax)

    out = deeponet_forward(domainPoints, timePoints, parabBDFunction,
                           parabBDPointsSpace, parabBDPointsTime,
                           trunk_params, branch_params,
                           n_layers_trunk, n_layers_branch)
    out = jax.block_until_ready(out)

    ref = _reference(domainPoints, timePoints, parabBDFunction,
                     parabBDPointsSpace, parabBDPointsTime,
                     trunk_params, branch_params,
                     n_layers_trunk, n_layers_branch)
    ref = jax.block_until_ready(ref)

    assert out.shape == (N, 1), out.shape
    assert bool(jnp.all(jnp.isfinite(out)))
    assert bool(jnp.allclose(out, ref, rtol=1e-3, atol=1e-3)), (
        float(jnp.max(jnp.abs(out - ref)))
    )
    print("KERNEL_OK")
</pallas_src>

<mosaic_0001>
module attributes {stable_mosaic.version = 11 : i64} {
  func.func @_deeponet_kernel(%arg0: memref<256x3xf32, #tpu.memory_space<vmem>>, %arg1: memref<1x16xf32, #tpu.memory_space<vmem>>, %arg2: memref<3x32xf32, #tpu.memory_space<vmem>>, %arg3: memref<1x32xf32, #tpu.memory_space<vmem>>, %arg4: memref<3x32x32xf32, #tpu.memory_space<vmem>>, %arg5: memref<3x1x32xf32, #tpu.memory_space<vmem>>, %arg6: memref<32x32xf32, #tpu.memory_space<vmem>>, %arg7: memref<1x32xf32, #tpu.memory_space<vmem>>, %arg8: memref<16x32xf32, #tpu.memory_space<vmem>>, %arg9: memref<1x32xf32, #tpu.memory_space<vmem>>, %arg10: memref<3x32x32xf32, #tpu.memory_space<vmem>>, %arg11: memref<3x1x32xf32, #tpu.memory_space<vmem>>, %arg12: memref<32x32xf32, #tpu.memory_space<vmem>>, %arg13: memref<1x32xf32, #tpu.memory_space<vmem>>, %arg14: memref<1x256xf32, #tpu.memory_space<vmem>>) attributes {dimension_semantics = [], scalar_prefetch = 0 : i64, scratch_operands = 0 : i64, tpu.core_type = #tpu.core_type<tc>} {
    %c0 = arith.constant 0 : index
    %c0_0 = arith.constant 0 : index
    %0 = vector.load %arg1[%c0, %c0_0] : memref<1x16xf32, #tpu.memory_space<vmem>>, vector<1x16xf32>
    %c0_1 = arith.constant 0 : index
    %c0_2 = arith.constant 0 : index
    %1 = vector.load %arg8[%c0_1, %c0_2] : memref<16x32xf32, #tpu.memory_space<vmem>>, vector<16x32xf32>
    %cst = arith.constant dense<0.000000e+00> : vector<1x32xf32>
    %2 = tpu.matmul %0, %1, %cst {dimension_numbers = #tpu.dot_dimension_numbers<[1], [0], [0], [1], [0, 0, 1, 1], [], []>} : vector<1x16xf32>, vector<16x32xf32>, vector<1x32xf32> -> vector<1x32xf32>
    %c0_3 = arith.constant 0 : index
    %c0_4 = arith.constant 0 : index
    %3 = vector.load %arg9[%c0_3, %c0_4] : memref<1x32xf32, #tpu.memory_space<vmem>>, vector<1x32xf32>
    %4 = arith.addf %2, %3 : vector<1x32xf32>
    %c0_5 = arith.constant 0 : index
    %c0_6 = arith.constant 0 : index
    %c0_7 = arith.constant 0 : index
    %5 = vector.load %arg10[%c0_5, %c0_6, %c0_7] : memref<3x32x32xf32, #tpu.memory_space<vmem>>, vector<1x32x32xf32>
    %6 = vector.shape_cast %5 : vector<1x32x32xf32> to vector<32x32xf32>
    %cst_8 = arith.constant dense<0.000000e+00> : vector<1x32xf32>
    %7 = tpu.matmul %4, %6, %cst_8 {dimension_numbers = #tpu.dot_dimension_numbers<[1], [0], [0], [1], [0, 0, 1, 1], [], []>} : vector<1x32xf32>, vector<32x32xf32>, vector<1x32xf32> -> vector<1x32xf32>
    %c0_9 = arith.constant 0 : index
    %c0_10 = arith.constant 0 : index
    %c0_11 = arith.constant 0 : index
    %8 = vector.load %arg11[%c0_9, %c0_10, %c0_11] : memref<3x1x32xf32, #tpu.memory_space<vmem>>, vector<1x1x32xf32>
    %9 = vector.shape_cast %8 : vector<1x1x32xf32> to vector<1x32xf32>
    %10 = arith.addf %7, %9 : vector<1x32xf32>
    %11 = math.tanh %10 : vector<1x32xf32>
    %c1 = arith.constant 1 : index
    %c0_12 = arith.constant 0 : index
    %c0_13 = arith.constant 0 : index
    %12 = vector.load %arg10[%c1, %c0_12, %c0_13] : memref<3x32x32xf32, #tpu.memory_space<vmem>>, vector<1x32x32xf32>
    %13 = vector.shape_cast %12 : vector<1x32x32xf32> to vector<32x32xf32>
    %cst_14 = arith.constant dense<0.000000e+00> : vector<1x32xf32>
    %14 = tpu.matmul %11, %13, %cst_14 {dimension_numbers = #tpu.dot_dimension_numbers<[1], [0], [0], [1], [0, 0, 1, 1], [], []>} : vector<1x32xf32>, vector<32x32xf32>, vector<1x32xf32> -> vector<1x32xf32>
    %c1_15 = arith.constant 1 : index
    %c0_16 = arith.constant 0 : index
    %c0_17 = arith.constant 0 : index
    %15 = vector.load %arg11[%c1_15, %c0_16, %c0_17] : memref<3x1x32xf32, #tpu.memory_space<vmem>>, vector<1x1x32xf32>
    %16 = vector.shape_cast %15 : vector<1x1x32xf32> to vector<1x32xf32>
    %17 = arith.addf %14, %16 : vector<1x32xf32>
    %18 = math.tanh %17 : vector<1x32xf32>
    %c2 = arith.constant 2 : index
    %c0_18 = arith.constant 0 : index
    %c0_19 = arith.constant 0 : index
    %19 = vector.load %arg10[%c2, %c0_18, %c0_19] : memref<3x32x32xf32, #tpu.memory_space<vmem>>, vector<1x32x32xf32>
    %20 = vector.shape_cast %19 : vector<1x32x32xf32> to vector<32x32xf32>
    %cst_20 = arith.constant dense<0.000000e+00> : vector<1x32xf32>
    %21 = tpu.matmul %18, %20, %cst_20 {dimension_numbers = #tpu.dot_dimension_numbers<[1], [0], [0], [1], [0, 0, 1, 1], [], []>} : vector<1x32xf32>, vector<32x32xf32>, vector<1x32xf32> -> vector<1x32xf32>
    %c2_21 = arith.constant 2 : index
    %c0_22 = arith.constant 0 : index
    %c0_23 = arith.constant 0 : index
    %22 = vector.load %arg11[%c2_21, %c0_22, %c0_23] : memref<3x1x32xf32, #tpu.memory_space<vmem>>, vector<1x1x32xf32>
    %23 = vector.shape_cast %22 : vector<1x1x32xf32> to vector<1x32xf32>
    %24 = arith.addf %21, %23 : vector<1x32xf32>
    %c0_24 = arith.constant 0 : index
    %c0_25 = arith.constant 0 : index
    %25 = vector.load %arg12[%c0_24, %c0_25] : memref<32x32xf32, #tpu.memory_space<vmem>>, vector<32x32xf32>
    %cst_26 = arith.constant dense<0.000000e+00> : vector<1x32xf32>
    %26 = tpu.matmul %24, %25, %cst_26 {dimension_numbers = #tpu.dot_dimension_numbers<[1], [0], [0], [1], [0, 0, 1, 1], [], []>} : vector<1x32xf32>, vector<32x32xf32>, vector<1x32xf32> -> vector<1x32xf32>
    %c0_27 = arith.constant 0 : index
    %c0_28 = arith.constant 0 : index
    %27 = vector.load %arg13[%c0_27, %c0_28] : memref<1x32xf32, #tpu.memory_space<vmem>>, vector<1x32xf32>
    %28 = arith.addf %26, %27 : vector<1x32xf32>
    %c0_29 = arith.constant 0 : index
    %c0_30 = arith.constant 0 : index
    %29 = vector.load %arg0[%c0_29, %c0_30] : memref<256x3xf32, #tpu.memory_space<vmem>>, vector<256x3xf32>
    %c0_31 = arith.constant 0 : index
    %c0_32 = arith.constant 0 : index
    %30 = vector.load %arg2[%c0_31, %c0_32] : memref<3x32xf32, #tpu.memory_space<vmem>>, vector<3x32xf32>
    %31 = vector.extract_strided_slice %29 {offsets = [0, 0], sizes = [256, 1], strides = [1, 1]} : vector<256x3xf32> to vector<256x1xf32>
    %32 = vector.extract_strided_slice %30 {offsets = [0, 0], sizes = [1, 32], strides = [1, 1]} : vector<3x32xf32> to vector<1x32xf32>
    %33 = vector.broadcast %31 : vector<256x1xf32> to vector<256x32xf32>
    %34 = vector.broadcast %32 : vector<1x32xf32> to vector<256x32xf32>
    %35 = arith.mulf %33, %34 : vector<256x32xf32>
    %36 = vector.extract_strided_slice %29 {offsets = [0, 1], sizes = [256, 1], strides = [1, 1]} : vector<256x3xf32> to vector<256x1xf32>
    %37 = vector.extract_strided_slice %30 {offsets = [1, 0], sizes = [1, 32], strides = [1, 1]} : vector<3x32xf32> to vector<1x32xf32>
    %38 = vector.broadcast %36 : vector<256x1xf32> to vector<256x32xf32>
    %39 = vector.broadcast %37 : vector<1x32xf32> to vector<256x32xf32>
    %40 = arith.mulf %38, %39 : vector<256x32xf32>
    %41 = arith.addf %35, %40 : vector<256x32xf32>
    %42 = vector.extract_strided_slice %29 {offsets = [0, 2], sizes = [256, 1], strides = [1, 1]} : vector<256x3xf32> to vector<256x1xf32>
    %43 = vector.extract_strided_slice %30 {offsets = [2, 0], sizes = [1, 32], strides = [1, 1]} : vector<3x32xf32> to vector<1x32xf32>
    %44 = vector.broadcast %42 : vector<256x1xf32> to vector<256x32xf32>
    %45 = vector.broadcast %43 : vector<1x32xf32> to vector<256x32xf32>
    %46 = arith.mulf %44, %45 : vector<256x32xf32>
    %47 = arith.addf %41, %46 : vector<256x32xf32>
    %c0_33 = arith.constant 0 : index
    %c0_34 = arith.constant 0 : index
    %48 = vector.load %arg3[%c0_33, %c0_34] : memref<1x32xf32, #tpu.memory_space<vmem>>, vector<1x32xf32>
    %49 = vector.broadcast %48 : vector<1x32xf32> to vector<256x32xf32>
    %50 = arith.addf %47, %49 : vector<256x32xf32>
    %c0_35 = arith.constant 0 : index
    %c0_36 = arith.constant 0 : index
    %c0_37 = arith.constant 0 : index
    %51 = vector.load %arg4[%c0_35, %c0_36, %c0_37] : memref<3x32x32xf32, #tpu.memory_space<vmem>>, vector<1x32x32xf32>
    %52 = vector.shape_cast %51 : vector<1x32x32xf32> to vector<32x32xf32>
    %cst_38 = arith.constant dense<0.000000e+00> : vector<256x32xf32>
    %53 = tpu.matmul %50, %52, %cst_38 {dimension_numbers = #tpu.dot_dimension_numbers<[1], [0], [0], [1], [0, 0, 1, 1], [], []>} : vector<256x32xf32>, vector<32x32xf32>, vector<256x32xf32> -> vector<256x32xf32>
    %c0_39 = arith.constant 0 : index
    %c0_40 = arith.constant 0 : index
    %c0_41 = arith.constant 0 : index
    %54 = vector.load %arg5[%c0_39, %c0_40, %c0_41] : memref<3x1x32xf32, #tpu.memory_space<vmem>>, vector<1x1x32xf32>
    %55 = vector.shape_cast %54 : vector<1x1x32xf32> to vector<1x32xf32>
    %56 = vector.broadcast %55 : vector<1x32xf32> to vector<256x32xf32>
    %57 = arith.addf %53, %56 : vector<256x32xf32>
    %58 = math.tanh %57 : vector<256x32xf32>
    %c1_42 = arith.constant 1 : index
    %c0_43 = arith.constant 0 : index
    %c0_44 = arith.constant 0 : index
    %59 = vector.load %arg4[%c1_42, %c0_43, %c0_44] : memref<3x32x32xf32, #tpu.memory_space<vmem>>, vector<1x32x32xf32>
    %60 = vector.shape_cast %59 : vector<1x32x32xf32> to vector<32x32xf32>
    %cst_45 = arith.constant dense<0.000000e+00> : vector<256x32xf32>
    %61 = tpu.matmul %58, %60, %cst_45 {dimension_numbers = #tpu.dot_dimension_numbers<[1], [0], [0], [1], [0, 0, 1, 1], [], []>} : vector<256x32xf32>, vector<32x32xf32>, vector<256x32xf32> -> vector<256x32xf32>
    %c1_46 = arith.constant 1 : index
    %c0_47 = arith.constant 0 : index
    %c0_48 = arith.constant 0 : index
    %62 = vector.load %arg5[%c1_46, %c0_47, %c0_48] : memref<3x1x32xf32, #tpu.memory_space<vmem>>, vector<1x1x32xf32>
    %63 = vector.shape_cast %62 : vector<1x1x32xf32> to vector<1x32xf32>
    %64 = vector.broadcast %63 : vector<1x32xf32> to vector<256x32xf32>
    %65 = arith.addf %61, %64 : vector<256x32xf32>
    %66 = math.tanh %65 : vector<256x32xf32>
    %c2_49 = arith.constant 2 : index
    %c0_50 = arith.constant 0 : index
    %c0_51 = arith.constant 0 : index
    %67 = vector.load %arg4[%c2_49, %c0_50, %c0_51] : memref<3x32x32xf32, #tpu.memory_space<vmem>>, vector<1x32x32xf32>
    %68 = vector.shape_cast %67 : vector<1x32x32xf32> to vector<32x32xf32>
    %cst_52 = arith.constant dense<0.000000e+00> : vector<256x32xf32>
    %69 = tpu.matmul %66, %68, %cst_52 {dimension_numbers = #tpu.dot_dimension_numbers<[1], [0], [0], [1], [0, 0, 1, 1], [], []>} : vector<256x32xf32>, vector<32x32xf32>, vector<256x32xf32> -> vector<256x32xf32>
    %c2_53 = arith.constant 2 : index
    %c0_54 = arith.constant 0 : index
    %c0_55 = arith.constant 0 : index
    %70 = vector.load %arg5[%c2_53, %c0_54, %c0_55] : memref<3x1x32xf32, #tpu.memory_space<vmem>>, vector<1x1x32xf32>
    %71 = vector.shape_cast %70 : vector<1x1x32xf32> to vector<1x32xf32>
    %72 = vector.broadcast %71 : vector<1x32xf32> to vector<256x32xf32>
    %73 = arith.addf %69, %72 : vector<256x32xf32>
    %c0_56 = arith.constant 0 : index
    %c0_57 = arith.constant 0 : index
    %74 = vector.load %arg6[%c0_56, %c0_57] : memref<32x32xf32, #tpu.memory_space<vmem>>, vector<32x32xf32>
    %cst_58 = arith.constant dense<0.000000e+00> : vector<256x32xf32>
    %75 = tpu.matmul %73, %74, %cst_58 {dimension_numbers = #tpu.dot_dimension_numbers<[1], [0], [0], [1], [0, 0, 1, 1], [], []>} : vector<256x32xf32>, vector<32x32xf32>, vector<256x32xf32> -> vector<256x32xf32>
    %c0_59 = arith.constant 0 : index
    %c0_60 = arith.constant 0 : index
    %76 = vector.load %arg7[%c0_59, %c0_60] : memref<1x32xf32, #tpu.memory_space<vmem>>, vector<1x32xf32>
    %77 = vector.broadcast %76 : vector<1x32xf32> to vector<256x32xf32>
    %78 = arith.addf %75, %77 : vector<256x32xf32>
    %cst_61 = arith.constant dense<0.000000e+00> : vector<1x256xf32>
    %79 = tpu.matmul %28, %78, %cst_61 {dimension_numbers = #tpu.dot_dimension_numbers<[1], [1], [0], [0], [0, 0, 1, 0], [], []>} : vector<1x32xf32>, vector<256x32xf32>, vector<1x256xf32> -> vector<1x256xf32>
    %c0_62 = arith.constant 0 : index
    %c0_63 = arith.constant 0 : index
    %80 = vector.load %arg14[%c0_62, %c0_63] : memref<1x256xf32, #tpu.memory_space<vmem>>, vector<1x256xf32>
    tpu.vector_store %arg14[%c0_62, %c0_63], %79 {strides = array<i32>} : memref<1x256xf32, #tpu.memory_space<vmem>>, vector<1x256xf32>,
    return
  }
}

</mosaic_0001>

<bundles_post_ra>
// kernel: tpu_custom_call.1
= control target key start
LH: loop header
LB: loop body
LE: loop exit
PB: predicated region body
PF: predicated region fallthrough
CT: control target
= control target key end

     0   :  { %19 = vsyncpa [#allocation3], 0  ;;  %s3362_s0 = inlined_call_operand.vmem [shape: f32[256,3], index: 0, kind: input, shape index: {}]   ;;  %s3363_s1 = inlined_call_operand.hbm [shape: f32[1,16], index: 1, kind: input, shape index: {}]   ;;  %s3364_s2 = inlined_call_operand.vmem [shape: f32[3,32], index: 2, kind: input, shape index: {}]   ;;  %s3365_s3 = inlined_call_operand.hbm [shape: f32[1,32], index: 3, kind: input, shape index: {}]   ;;  %s3366_s4 = inlined_call_operand.vmem [shape: f32[3,32,32], index: 4, kind: input, shape index: {}]   ;;  %s3367_s5 = inlined_call_operand.vmem [shape: f32[3,1,32], index: 5, kind: input, shape index: {}]   ;;  %s3368_s6 = inlined_call_operand.vmem [shape: f32[32,32], index: 6, kind: input, shape index: {}]   ;;  %s3369_s7 = inlined_call_operand.vmem [shape: f32[1,32], index: 7, kind: input, shape index: {}]   ;;  %s3370_s8 = inlined_call_operand.hbm [shape: f32[16,32], index: 8, kind: input, shape index: {}]   ;;  %s3371_s9 = inlined_call_operand.vmem [shape: f32[1,32], index: 9, kind: input, shape index: {}]   ;;  %s3372_s10 = inlined_call_operand.vmem [shape: f32[3,32,32], index: 10, kind: input, shape index: {}]   ;;  %s3373_s11 = inlined_call_operand.vmem [shape: f32[3,1,32], index: 11, kind: input, shape index: {}]   ;;  %s3374_s12 = inlined_call_operand.vmem [shape: f32[32,32], index: 12, kind: input, shape index: {}]   ;;  %s3375_s13 = inlined_call_operand.vmem [shape: f32[1,32], index: 13, kind: input, shape index: {}]   ;;  %s3376_s14 = inlined_call_operand.hbm [shape: f32[1,256], index: 14, kind: output, shape index: {}]  }
   0x1   :  { %20 = vsyncpa [#allocation6], 0  ;;  %s42_s15 = sshll.u32 %s3365_s3, 4  ;;  %s43_s15 = int_to_ptr.hbm [resolvable:$true] %s42_s15 }
   0x2   :  { %21 = vsyncpa [#allocation4], 0  ;;  %s2483_s16 = smov [#allocation5]   ;;  %s29_s20 = sshll.u32 %s3363_s1, 4  ;;  %s30_s20 = int_to_ptr.hbm [resolvable:$true] %s29_s20 }
   0x3   :  { %s44_s17 = sshll.u32 %s2483_s16, 4  ;;  %s2484_s21 = smov [#allocation2]   ;;  %s45_s17 = int_to_ptr.vmem [resolvable:$true] %s44_s17 }
   0x4   :  { %47 = dma.hbm_to_vmem [thread:$0]  %s43_s15, 16, %s45_s17, [#allocation6]  }
   0x5   :  { %s31_s22 = sshll.u32 %s2484_s21, 4  ;;  %s60_s25 = sshll.u32 %s3370_s8, 4  ;;  %s32_s22 = int_to_ptr.vmem [resolvable:$true] %s31_s22  ;;  %s61_s25 = int_to_ptr.hbm [resolvable:$true] %s60_s25 }
   0x6   :  { %34 = dma.hbm_to_vmem [thread:$0]  %s30_s20, 16, %s32_s22, [#allocation3]  }
   0x7   :  { %s2485_s3 = smov [#allocation7]   ;;  %s2486_s27 = smov 128  }
   0x8   :  { %s62_s26 = sshll.u32 %s2485_s3, 4  ;;  %s2487_s28 = smov 8   ;;  %s63_s26 = int_to_ptr.vmem [resolvable:$true] %s62_s26 }
   0x9   :  { %68 = dma.hbm_to_vmem [thread:$0]  %s61_s25, 256, %s63_s26, [#allocation6], %s2486_s27, %s2486_s27, %s2487_s28  }
   0xa   :  { %2477 = dma.done.wait [#allocation3], 16  }
   0xb   :  { %2478 = vsyncadd [#allocation3], 4294967280 }
   0xc   :  { %2479 = dma.done.wait [#allocation6], 272  }
   0xd   :  { %2480 = vsyncadd [#allocation6], 4294967024  ;;  %v2488_v0 = vmov 2   ;;  %v2489_v1 = vmov 0   ;;  %v2490_v2 = vmov 1   ;;  %v238_v3 = vld [vmem:[%s3362_s0] sm:$0xff] }
   0xe   :  { %2188 = vset.pattern.permute.xlu1 %v2488_v0  ;;  %2186 = vset.pattern.permute.xlu0 %v2489_v1  ;;  %v93_v4 = vld [vmem:[#allocation7 + $0x8] sm:$0xff]  ;;  %v92_v5 = vld [vmem:[#allocation7] sm:$0xff]  ;;  %v91_v7 = vld [vmem:[#allocation2] sm:$0x1]  ;;  %vm95_vm0 = vcmask 130048   ;;  %vm124_vm1 = vcmask 261120  }
   0xf   :  { %2190 = vset.pattern.permute.xlu2 %v2490_v2  ;;  %658 = vperm.xlu1 %2188, %v238_v3   ;;  %v239_v6 = vld [vmem:[%s3362_s0 + $0x8] sm:$0xff]  ;;  %v240_v8 = vld [vmem:[%s3362_s0 + $0x10] sm:$0xff]  ;;  %v241_v9 = vld [vmem:[%s3362_s0 + $0x18] sm:$0xff]  ;;  %s1979_s26 = sshll.u32 %s3376_s14, 4  ;;  %vm1964_vm2 = vcmask 1040384   ;;  %s1980_s26 = int_to_ptr.hbm [resolvable:$true] %s1979_s26 }
  0x10   :  { %273 = vperm.xlu0 %2186, %v238_v3   ;;  %113 = vmatpush.msra.mxu0 %v93_v4  ;;  %v245_v10 = vld [vmem:[%s3362_s0 + $0x38] sm:$0xff]  ;;  %v242_v11 = vld [vmem:[%s3362_s0 + $0x20] sm:$0xff]  ;;  %v247_v12 = vld [vmem:[%s3362_s0 + $0x48] sm:$0xff] }
  0x11   :  { %469 = vperm.xlu2 %2190, %v239_v6   ;;  %v243_v13 = vld [vmem:[%s3362_s0 + $0x28] sm:$0xff]  ;;  %v244_v14 = vld [vmem:[%s3362_s0 + $0x30] sm:$0xff]  ;;  %v249_v15 = vld [vmem:[%s3362_s0 + $0x58] sm:$0xff] }
  0x12   :  { %114 = vmatpush.msra.mxu0 %v92_v5  ;;  %v246_v16 = vld [vmem:[%s3362_s0 + $0x40] sm:$0xff]  ;;  %v122_v19 = vld [vmem:[%s3372_s10 + $0x18] sm:$0xff]  ;;  %v121_v20 = vld [vmem:[%s3372_s10 + $0x10] sm:$0xff] }
  0x13   :  { %1990 = vmatmul.msk.f32.vlgmr.msra.gmra.mxu0 %vm95_vm0, %v91_v7  ;;  %v250_v17 = vld [vmem:[%s3362_s0 + $0x60] sm:$0xff]  ;;  %140 = vmatpush.msra.mxu1 %v122_v19  ;;  %v248_v21 = vld [vmem:[%s3362_s0 + $0x50] sm:$0xff]  ;;  %v120_v22 = vld [vmem:[%s3372_s10 + $0x8] sm:$0xff] }
  0x14   :  { %v119_v23 = vld [vmem:[%s3372_s10] sm:$0xff]  ;;  %v889_v24 = vld [vmem:[%s3366_s4 + $0x18] sm:$0xff]  ;;  %v888_v26 = vld [vmem:[%s3366_s4 + $0x10] sm:$0xff] }
  0x15   :  { %141 = vmatpush.msra.mxu1 %v121_v20  ;;  %v887_v27 = vld [vmem:[%s3366_s4 + $0x8] sm:$0xff]  ;;  %v252_v28 = vld [vmem:[%s3362_s0 + $0x70] sm:$0xff]  ;;  %v886_v29 = vld [vmem:[%s3366_s4] sm:$0xff] }
  0x16   :  { %v270_v34 = vld [vmem:[%s3364_s2] sm:$0x7]  ;;  %v251_v39 = vld [vmem:[%s3362_s0 + $0x68] sm:$0xff]  ;;  %v257_v20 = vld [vmem:[%s3362_s0 + $0x98] sm:$0xff] }
  0x17   :  { %2189 = vset.pattern.permute.xlu1 %v2489_v1  ;;  %142 = vmatpush.msra.mxu1 %v120_v22  ;;  %v2674_v35 = vperm.slane %v270_v34, 0  ;;  %v2676_v38 = vperm.slane %v270_v34, 1  ;;  %v94_v42 = vld [vmem:[%s3371_s9] sm:$0x1]  ;;  %v2691_v45 = vperm.slane %v270_v34, 2  ;;  %v255_v60 = vld [vmem:[%s3362_s0 + $0x88] sm:$0xff] }
  0x18   :  { %2187 = vset.pattern.permute.xlu0 %v2490_v2  ;;  %278 = vperm.xlu1 %2189, %v239_v6   ;;  %v2689_v44 = vld [vmem:[%s3362_s0 + $0x80] sm:$0xff] }
  0x19   :  { %465 = vperm.xlu0 %2187, %v238_v3   ;;  %2191 = vset.pattern.permute.xlu2 %v2488_v0  ;;  %v2697_v53 = vld [vmem:[#allocation5] ss:$0 sm:$0xff] }
  0x1a   :  { %662 = vperm.xlu2 %2191, %v239_v6   ;;  %143 = vmatpush.msra.mxu1 %v119_v23 }
  0x1c   :  { %1002 = vmatpush.msrb.mxu1 %v889_v24 }
  0x1e   :  { %1003 = vmatpush.msrb.mxu1 %v888_v26 }
  0x20   :  { %283 = vperm.xlu1 %2189, %v240_v8   ;;  %1004 = vmatpush.msrb.mxu1 %v887_v27 }
  0x21   :  { %2193 = vset.pattern.permute.xlu0 %v2488_v0 }
  0x22   :  { %666 = vperm.xlu0 %2193, %v240_v8   ;;  %2192 = vset.pattern.permute.xlu2 %v2490_v2 }
  0x23   :  { %473 = vperm.xlu2 %2192, %v240_v8   ;;  %1005 = vmatpush.msrb.mxu1 %v886_v29 }
  0x28   :  { %288 = vperm.xlu1 %2189, %v241_v9  }
  0x2a   :  { %686 = vperm.xlu0 %2193, %v245_v10  }
  0x2b   :  { %477 = vperm.xlu2 %2192, %v241_v9  }
  0x30   :  { %2194 = vset.pattern.permute.xlu1 %v2488_v0 }
  0x31   :  { %670 = vperm.xlu1 %2194, %v241_v9   ;;  %v253_v9 = vld [vmem:[%s3362_s0 + $0x78] sm:$0xff] }
  0x32   :  { %2200 = vset.pattern.permute.xlu0 %v2490_v2 }
  0x33   :  { %481 = vperm.xlu0 %2200, %v242_v11   ;;  %2195 = vset.pattern.permute.xlu2 %v2489_v1 }
  0x34   :  { %293 = vperm.xlu2 %2195, %v242_v11  }
  0x39   :  { %674 = vperm.xlu1 %2194, %v242_v11  }
  0x3b   :  { %501 = vperm.xlu0 %2200, %v247_v12  }
  0x3c   :  { %298 = vperm.xlu2 %2195, %v243_v13  }
  0x41   :  { %2196 = vset.pattern.permute.xlu1 %v2490_v2 }
  0x42   :  { %485 = vperm.xlu1 %2196, %v243_v13  }
  0x43   :  { %2203 = vset.pattern.permute.xlu0 %v2489_v1 }
  0x44   :  { %303 = vperm.xlu0 %2203, %v244_v14   ;;  %2197 = vset.pattern.permute.xlu2 %v2488_v0 }
  0x45   :  { %678 = vperm.xlu2 %2197, %v243_v13  }
  0x4a   :  { %489 = vperm.xlu1 %2196, %v244_v14  }
  0x4c   :  { %328 = vperm.xlu0 %2203, %v249_v15  }
  0x4d   :  { %682 = vperm.xlu2 %2197, %v244_v14  }
  0x52   :  { %2198 = vset.pattern.permute.xlu1 %v2489_v1 }
  0x53   :  { %308 = vperm.xlu1 %2198, %v245_v10  }
  0x54   :  { %2208 = vset.pattern.permute.xlu0 %v2488_v0 }
  0x55   :  { %2199 = vset.pattern.permute.xlu2 %v2490_v2  ;;  %706 = vperm.xlu0 %2208, %v250_v17  }
  0x56   :  { %493 = vperm.xlu2 %2199, %v245_v10  }
  0x5b   :  { %313 = vperm.xlu1 %2198, %v246_v16  }
  0x5d   :  { %2211 = vset.pattern.permute.xlu0 %v2490_v2 }
  0x5e   :  { %497 = vperm.xlu2 %2199, %v246_v16   ;;  %521 = vperm.xlu0 %2211, %v252_v28  }
  0x63   :  { %2201 = vset.pattern.permute.xlu1 %v2488_v0 }
  0x64   :  { %690 = vperm.xlu1 %2201, %v246_v16  }
  0x66   :  { %2202 = vset.pattern.permute.xlu2 %v2489_v1  ;;  %2214 = vset.pattern.permute.xlu0 %v2489_v1 }
  0x67   :  { %318 = vperm.xlu2 %2202, %v247_v12   ;;  %353 = vperm.xlu0 %2214, %v2689_v44  }
  0x6b   :  { %v2631_v18 = vpop.permute.xlu2 %469 }
  0x6c   :  { %694 = vperm.xlu1 %2201, %v247_v12   ;;  %v594_v56 = vmul.f32 %v2676_v38, %v2631_v18 }
  0x6f   :  { %323 = vperm.xlu2 %2202, %v248_v21   ;;  %2217 = vset.pattern.permute.xlu0 %v2488_v0 }
  0x70   :  { %726 = vperm.xlu0 %2217, %v255_v60  }
  0x74   :  { %2204 = vset.pattern.permute.xlu1 %v2490_v2  ;;  %v663_v25 = vpop.permute.xlu2 %662 }
  0x75   :  { %505 = vperm.xlu1 %2204, %v248_v21   ;;  %v787_v57 = vmul.f32 %v2691_v45, %v663_v25 }
  0x77   :  { %2205 = vset.pattern.permute.xlu2 %v2488_v0 }
  0x78   :  { %698 = vperm.xlu2 %2205, %v248_v21   ;;  %2220 = vset.pattern.permute.xlu0 %v2490_v2 }
  0x79   :  { %541 = vperm.xlu0 %2220, %v257_v20  }
  0x7d   :  { %509 = vperm.xlu1 %2204, %v249_v15   ;;  %v474_v30 = vpop.permute.xlu2 %473 }
  0x7e   :  { %v595_v63 = vmul.f32 %v2676_v38, %v474_v30 }
  0x80   :  { %702 = vperm.xlu2 %2205, %v249_v15  }
  0x81   :  { %v659_v31 = vpop.permute.xlu1 %658  ;;  %2223 = vset.pattern.permute.xlu0 %v2489_v1 }
  0x82   :  { %v274_v32 = vpop.permute.xlu0 %273  ;;  %v786_v50 = vmul.f32 %v2691_v45, %v659_v31 }
  0x83   :  { %v432_v40 = vmul.f32 %v2674_v35, %v274_v32 }
  0x85   :  { %2206 = vset.pattern.permute.xlu1 %v2489_v1  ;;  %v2668_v33 = vpop.permute.xlu2 %477 }
  0x86   :  { %333 = vperm.xlu1 %2206, %v250_v17   ;;  %v596_v15 = vmul.f32 %v2676_v38, %v2668_v33 }
  0x88   :  { %2207 = vset.pattern.permute.xlu2 %v2490_v2 }
  0x89   :  { %513 = vperm.xlu2 %2207, %v250_v17  }
  0x8a   :  { %v279_v36 = vpop.permute.xlu1 %278 }
  0x8b   :  { %v466_v37 = vpop.permute.xlu0 %465  ;;  %v433_v52 = vmul.f32 %v2674_v35, %v279_v36 }
  0x8c   :  { %v593_v41 = vmul.f32 %v2676_v38, %v466_v37 }
  0x8d   :  { %v626_v58 = vadd.f32 %v594_v56, %v433_v52 }
  0x8e   :  { %338 = vperm.xlu1 %2206, %v251_v39   ;;  %v294_v43 = vpop.permute.xlu2 %293  ;;  %v625_v47 = vadd.f32 %v593_v41, %v432_v40 }
  0x8f   :  { %v819_v62 = vadd.f32 %v787_v57, %v626_v58  ;;  %v436_v22 = vmul.f32 %v2674_v35, %v294_v43 }
  0x90   :  { %v116_v46 = vpop.f32.mrf.mxu0  ;;  %v818_v54 = vadd.f32 %v786_v50, %v625_v47 }
  0x91   :  { %v117_v48 = vadd.f32 %v116_v46, %v94_v42  ;;  %517 = vperm.xlu2 %2207, %v251_v39   ;;  %v855_v8 = vadd.f32 %v2697_v53, %v819_v62 }
  0x92   :  { %v284_v49 = vpop.permute.xlu1 %283  ;;  %v854_v59 = vadd.f32 %v2697_v53, %v818_v54 }
  0x93   :  { %1991 = vmatmul.msk.f32.vlgmr.msra.gmra.mxu1 %vm124_vm1, %v117_v48  ;;  %v434_v3 = vmul.f32 %v2674_v35, %v284_v49  ;;  %v259_v49 = vld [vmem:[%s3362_s0 + $0xa8] sm:$0xff] }
  0x94   :  { %v667_v51 = vpop.permute.xlu0 %666  ;;  %378 = vperm.xlu0 %2223, %v259_v49  }
  0x95   :  { %v627_v6 = vadd.f32 %v595_v63, %v434_v3  ;;  %v788_v7 = vmul.f32 %v2691_v45, %v667_v51 }
  0x96   :  { %2209 = vset.pattern.permute.xlu1 %v2488_v0  ;;  %v299_v55 = vpop.permute.xlu2 %298 }
  0x97   :  { %710 = vperm.xlu1 %2209, %v251_v39   ;;  %v820_v11 = vadd.f32 %v788_v7, %v627_v6  ;;  %v437_v32 = vmul.f32 %v2674_v35, %v299_v55 }
  0x99   :  { %2210 = vset.pattern.permute.xlu2 %v2489_v1  ;;  %v856_v17 = vadd.f32 %v2697_v53, %v820_v11 }
  0x9a   :  { %v289_v61 = vpop.permute.xlu1 %288  ;;  %343 = vperm.xlu2 %2210, %v252_v28  }
  0x9b   :  { %2005 = vmatmul.msk.f32.vlgmr.msrb.gmra.mxu1 %vm124_vm1, %v854_v59  ;;  %v435_v12 = vmul.f32 %v2674_v35, %v289_v61 }
  0x9c   :  { %v2712_v4 = vpop.permute.xlu0 %686  ;;  %2226 = vset.pattern.permute.xlu0 %v2488_v0 }
  0x9d   :  { %v628_v18 = vadd.f32 %v596_v15, %v435_v12  ;;  %v793_v56 = vmul.f32 %v2691_v45, %v2712_v4  ;;  %v2791_v15 = vld [vmem:[%s3362_s0 + $0xc0] sm:$0xff] }
  0x9f   :  { %714 = vperm.xlu1 %2209, %v252_v28   ;;  %v679_v5 = vpop.permute.xlu2 %678 }
  0xa0   :  { %v791_v34 = vmul.f32 %v2691_v45, %v679_v5  ;;  %v258_v5 = vld [vmem:[%s3362_s0 + $0xa0] sm:$0xff] }
  0xa2   :  { %348 = vperm.xlu2 %2210, %v253_v9  }
  0xa3   :  { %2006 = vmatmul.msk.f32.gmra.mxu1 %vm124_vm1, %v855_v8  ;;  %v671_v10 = vpop.permute.xlu1 %670 }
  0xa4   :  { %v789_v16 = vmul.f32 %v2691_v45, %v671_v10 }
  0xa5   :  { %v482_v14 = vpop.permute.xlu0 %481 }
  0xa6   :  { %v821_v21 = vadd.f32 %v789_v16, %v628_v18  ;;  %v597_v23 = vmul.f32 %v2676_v38, %v482_v14 }
  0xa7   :  { %2212 = vset.pattern.permute.xlu1 %v2490_v2  ;;  %v683_v13 = vpop.permute.xlu2 %682 }
  0xa8   :  { %525 = vperm.xlu1 %2212, %v253_v9   ;;  %v857_v27 = vadd.f32 %v2697_v53, %v821_v21  ;;  %v629_v28 = vadd.f32 %v597_v23, %v436_v22  ;;  %v792_v50 = vmul.f32 %v2691_v45, %v683_v13 }
  0xaa   :  { %2213 = vset.pattern.permute.xlu2 %v2488_v0 }
  0xab   :  { %2007 = vmatmul.msk.f32.gmra.mxu1 %vm124_vm1, %v856_v17  ;;  %v675_v19 = vpop.permute.xlu1 %674  ;;  %718 = vperm.xlu2 %2213, %v253_v9  }
  0xac   :  { %v790_v26 = vmul.f32 %v2691_v45, %v675_v19 }
  0xad   :  { %v2735_v24 = vpop.permute.xlu0 %501 }
  0xae   :  { %v822_v30 = vadd.f32 %v790_v26, %v629_v28  ;;  %v602_v12 = vmul.f32 %v2676_v38, %v2735_v24 }
  0xb0   :  { %529 = vperm.xlu1 %2212, %v2689_v44   ;;  %v494_v25 = vpop.permute.xlu2 %493  ;;  %v858_v37 = vadd.f32 %v2697_v53, %v822_v30 }
  0xb1   :  { %v600_v52 = vmul.f32 %v2676_v38, %v494_v25 }
  0xb3   :  { %2008 = vmatmul.msk.f32.gmra.mxu1 %vm124_vm1, %v857_v27  ;;  %722 = vperm.xlu2 %2213, %v2689_v44   ;;  %v256_v44 = vld [vmem:[%s3362_s0 + $0x90] sm:$0xff] }
  0xb4   :  { %v486_v29 = vpop.permute.xlu1 %485 }
  0xb5   :  { %v598_v31 = vmul.f32 %v2676_v38, %v486_v29 }
  0xb6   :  { %v304_v39 = vpop.permute.xlu0 %303 }
  0xb7   :  { %v630_v36 = vadd.f32 %v598_v31, %v437_v32  ;;  %v438_v43 = vmul.f32 %v2674_v35, %v304_v39  ;;  %v1995_v39 = vld [vmem:[%s3372_s10 + $0x38] sm:$0xff] }
  0xb8   :  { %2215 = vset.pattern.permute.xlu1 %v2489_v1  ;;  %v498_v33 = vpop.permute.xlu2 %497  ;;  %171 = vmatpush.msra.mxu2 %v1995_v39 }
  0xb9   :  { %358 = vperm.xlu1 %2215, %v255_v60   ;;  %v823_v41 = vadd.f32 %v791_v34, %v630_v36  ;;  %v601_v6 = vmul.f32 %v2676_v38, %v498_v33  ;;  %v261_v34 = vld [vmem:[%s3362_s0 + $0xb8] sm:$0xff] }
  0xbb   :  { %2009 = vmatmul.msk.f32.gmra.mxu1 %vm124_vm1, %v858_v37  ;;  %2216 = vset.pattern.permute.xlu2 %v2490_v2  ;;  %v859_v47 = vadd.f32 %v2697_v53, %v823_v41 }
  0xbc   :  { %v490_v40 = vpop.permute.xlu1 %489  ;;  %533 = vperm.xlu2 %2216, %v255_v60   ;;  %v260_v60 = vld [vmem:[%s3362_s0 + $0xb0] sm:$0xff] }
  0xbd   :  { %v599_v42 = vmul.f32 %v2676_v38, %v490_v40  ;;  %746 = vperm.xlu0 %2226, %v260_v60  }
  0xbe   :  { %v329_v27 = vpop.permute.xlu0 %328 }
  0xbf   :  { %v631_v46 = vadd.f32 %v599_v42, %v438_v43  ;;  %v443_v30 = vmul.f32 %v2674_v35, %v329_v27  ;;  %v1994_v42 = vld [vmem:[%s3372_s10 + $0x30] sm:$0xff] }
  0xc0   :  { %v2820_v43 = vld [vmem:[%s3362_s0 + $0xd0] sm:$0xff]  ;;  %172 = vmatpush.msra.mxu2 %v1994_v42 }
  0xc1   :  { %363 = vperm.xlu1 %2215, %v256_v44   ;;  %v319_v48 = vpop.permute.xlu2 %318  ;;  %v824_v51 = vadd.f32 %v792_v50, %v631_v46  ;;  %v1992_v50 = vld [vmem:[%s3372_s10 + $0x20] sm:$0xff] }
  0xc2   :  { %v441_v13 = vmul.f32 %v2674_v35, %v319_v48 }
  0xc3   :  { %2010 = vmatmul.msk.f32.gmra.mxu1 %vm124_vm1, %v859_v47  ;;  %v860_v58 = vadd.f32 %v2697_v53, %v824_v51  ;;  %v1993_v47 = vld [vmem:[%s3372_s10 + $0x28] sm:$0xff] }
  0xc4   :  { %537 = vperm.xlu2 %2216, %v256_v44   ;;  %v634_v17 = vadd.f32 %v602_v12, %v441_v13  ;;  %173 = vmatpush.msra.mxu2 %v1993_v47 }
  0xc5   :  { %v309_v54 = vpop.permute.xlu1 %308  ;;  %2229 = vset.pattern.permute.xlu0 %v2490_v2 }
  0xc6   :  { %v439_v55 = vmul.f32 %v2674_v35, %v309_v54  ;;  %561 = vperm.xlu0 %2229, %v2791_v15   ;;  %174 = vmatpush.msra.mxu2 %v1992_v50  ;;  %v2040_v54 = vld [vmem:[%s3366_s4 + $0x38] sm:$0xff] }
  0xc7   :  { %v707_v46 = vpop.permute.xlu0 %706 }
  0xc8   :  { %v632_v57 = vadd.f32 %v600_v52, %v439_v55  ;;  %v798_v52 = vmul.f32 %v2691_v45, %v707_v46  ;;  %1253 = vmatpush.msrb.mxu2 %v2040_v54 }
  0xc9   :  { %2218 = vset.pattern.permute.xlu1 %v2488_v0  ;;  %v324_v59 = vpop.permute.xlu2 %323 }
  0xca   :  { %730 = vperm.xlu1 %2218, %v256_v44   ;;  %v825_v61 = vadd.f32 %v793_v56, %v632_v57  ;;  %v442_v23 = vmul.f32 %v2674_v35, %v324_v59  ;;  %v2039_v57 = vld [vmem:[%s3366_s4 + $0x30] sm:$0xff]  ;;  %v2038_v59 = vld [vmem:[%s3366_s4 + $0x28] sm:$0xff] }
  0xcb   :  { %2011 = vmatmul.msk.f32.gmra.mxu1 %vm124_vm1, %v860_v58  ;;  %1254 = vmatpush.msrb.mxu2 %v2039_v57 }
  0xcc   :  { %2219 = vset.pattern.permute.xlu2 %v2489_v1  ;;  %v861_v63 = vadd.f32 %v2697_v53, %v825_v61  ;;  %v2850_v61 = vld [vmem:[%s3362_s0 + $0xd8] sm:$0xff] }
  0xcd   :  { %v314_v62 = vpop.permute.xlu1 %313  ;;  %368 = vperm.xlu2 %2219, %v257_v20   ;;  %1255 = vmatpush.msrb.mxu2 %v2038_v59  ;;  %v2916_v59 = vld [vmem:[%s3362_s0 + $0xf8] sm:$0xff] }
  0xce   :  { %v440_v4 = vmul.f32 %v2674_v35, %v314_v62  ;;  %2232 = vset.pattern.permute.xlu0 %v2489_v1 }
  0xcf   :  { %403 = vperm.xlu0 %2232, %v2820_v43  }
  0xd0   :  { %v633_v8 = vadd.f32 %v601_v6, %v440_v4 }
  0xd2   :  { %734 = vperm.xlu1 %2218, %v257_v20   ;;  %v699_v3 = vpop.permute.xlu2 %698 }
  0xd3   :  { %2012 = vmatmul.msk.f32.gmra.mxu1 %vm124_vm1, %v861_v63  ;;  %v796_v24 = vmul.f32 %v2691_v45, %v699_v3  ;;  %v2037_v63 = vld [vmem:[%s3366_s4 + $0x20] sm:$0xff] }
  0xd4   :  { %1256 = vmatpush.msrb.mxu2 %v2037_v63 }
  0xd5   :  { %373 = vperm.xlu2 %2219, %v258_v5  }
  0xd6   :  { %v691_v7 = vpop.permute.xlu1 %690 }
  0xd7   :  { %v794_v9 = vmul.f32 %v2691_v45, %v691_v7  ;;  %2235 = vset.pattern.permute.xlu0 %v2488_v0 }
  0xd8   :  { %766 = vperm.xlu0 %2235, %v2850_v61  }
  0xd9   :  { %v826_v10 = vadd.f32 %v794_v9, %v633_v8 }
  0xda   :  { %2221 = vset.pattern.permute.xlu1 %v2490_v2  ;;  %v703_v11 = vpop.permute.xlu2 %702 }
  0xdb   :  { %545 = vperm.xlu1 %2221, %v258_v5   ;;  %v862_v14 = vadd.f32 %v2697_v53, %v826_v10  ;;  %v797_v36 = vmul.f32 %v2691_v45, %v703_v11  ;;  %v522_v10 = vpop.permute.xlu0 %521 }
  0xdd   :  { %2013 = vmatmul.msk.f32.gmra.mxu1 %vm124_vm1, %v862_v14  ;;  %2222 = vset.pattern.permute.xlu2 %v2488_v0  ;;  %v607_v14 = vmul.f32 %v2676_v38, %v522_v10 }
  0xde   :  { %v695_v16 = vpop.permute.xlu1 %694  ;;  %738 = vperm.xlu2 %2222, %v258_v5   ;;  %v263_v5 = vld [vmem:[%s3362_s0 + $0xc8] sm:$0xff] }
  0xdf   :  { %v795_v18 = vmul.f32 %v2691_v45, %v695_v16 }
  0xe0   :  { %2238 = vset.pattern.permute.xlu0 %v2490_v2 }
  0xe1   :  { %v827_v19 = vadd.f32 %v795_v18, %v634_v17 }
  0xe3   :  { %549 = vperm.xlu1 %2221, %v259_v49   ;;  %v863_v20 = vadd.f32 %v2697_v53, %v827_v19  ;;  %v514_v21 = vpop.permute.xlu2 %513 }
  0xe4   :  { %v605_v48 = vmul.f32 %v2676_v38, %v514_v21 }
  0xe5   :  { %2014 = vmatmul.msk.f32.gmra.mxu1 %vm124_vm1, %v863_v20 }
  0xe6   :  { %742 = vperm.xlu2 %2222, %v259_v49  }
  0xe7   :  { %v506_v22 = vpop.permute.xlu1 %505 }
  0xe8   :  { %v603_v25 = vmul.f32 %v2676_v38, %v506_v22  ;;  %v2879_v22 = vld [vmem:[%s3362_s0 + $0xe8] sm:$0xff] }
  0xe9   :  { %581 = vperm.xlu0 %2238, %v2879_v22  }
  0xea   :  { %v635_v26 = vadd.f32 %v603_v25, %v442_v23 }
  0xeb   :  { %2224 = vset.pattern.permute.xlu1 %v2489_v1  ;;  %v518_v28 = vpop.permute.xlu2 %517 }
  0xec   :  { %v828_v29 = vadd.f32 %v796_v24, %v635_v26  ;;  %383 = vperm.xlu1 %2224, %v260_v60   ;;  %v606_v6 = vmul.f32 %v2676_v38, %v518_v28  ;;  %v2885_v24 = vld [vmem:[%s3367_s5] ss:$0 sm:$0xff] }
  0xee   :  { %v864_v31 = vadd.f32 %v2697_v53, %v828_v29  ;;  %2225 = vset.pattern.permute.xlu2 %v2490_v2 }
  0xef   :  { %v510_v32 = vpop.permute.xlu1 %509  ;;  %553 = vperm.xlu2 %2225, %v260_v60  }
  0xf0   :  { %v604_v33 = vmul.f32 %v2676_v38, %v510_v32  ;;  %2015 = vmatmul.msk.f32.gmra.mxu1 %vm124_vm1, %v864_v31 }
  0xf1   :  { %2241 = vset.pattern.permute.xlu0 %v2489_v1 }
  0xf2   :  { %v636_v37 = vadd.f32 %v604_v33, %v443_v30  ;;  %428 = vperm.xlu0 %2241, %v2916_v59  }
  0xf4   :  { %v829_v40 = vadd.f32 %v797_v36, %v636_v37  ;;  %388 = vperm.xlu1 %2224, %v261_v34   ;;  %v344_v41 = vpop.permute.xlu2 %343  ;;  %v354_v36 = vpop.permute.xlu0 %353 }
  0xf5   :  { %v446_v13 = vmul.f32 %v2674_v35, %v344_v41 }
  0xf6   :  { %v865_v44 = vadd.f32 %v2697_v53, %v829_v40 }
  0xf7   :  { %557 = vperm.xlu2 %2225, %v261_v34   ;;  %v639_v20 = vadd.f32 %v607_v14, %v446_v13 }
  0xf8   :  { %v334_v49 = vpop.permute.xlu1 %333  ;;  %2016 = vmatmul.msk.f32.gmra.mxu1 %vm124_vm1, %v865_v44 }
  0xf9   :  { %v444_v51 = vmul.f32 %v2674_v35, %v334_v49 }
  0xfa   :  { %2242 = vset.pattern.permute.xlu0 %v2488_v0 }
  0xfb   :  { %v637_v55 = vadd.f32 %v605_v48, %v444_v51  ;;  %v266_v48 = vld [vmem:[%s3362_s0 + $0xe0] sm:$0xff] }
  0xfc   :  { %2227 = vset.pattern.permute.xlu1 %v2488_v0  ;;  %v349_v56 = vpop.permute.xlu2 %348 }
  0xfd   :  { %v830_v58 = vadd.f32 %v798_v52, %v637_v55  ;;  %750 = vperm.xlu1 %2227, %v261_v34   ;;  %v447_v31 = vmul.f32 %v2674_v35, %v349_v56 }
  0xff   :  { %v866_v60 = vadd.f32 %v2697_v53, %v830_v58  ;;  %2228 = vset.pattern.permute.xlu2 %v2489_v1  ;;  %v727_v58 = vpop.permute.xlu0 %726 }
 0x100   :  { %v339_v62 = vpop.permute.xlu1 %338  ;;  %393 = vperm.xlu2 %2228, %v2791_v15   ;;  %v803_v63 = vmul.f32 %v2691_v45, %v727_v58 }
 0x101   :  { %2017 = vmatmul.msk.f32.gmra.mxu1 %vm124_vm1, %v866_v60  ;;  %v445_v4 = vmul.f32 %v2674_v35, %v339_v62 }
 0x103   :  { %v638_v8 = vadd.f32 %v606_v6, %v445_v4 }
 0x105   :  { %754 = vperm.xlu1 %2227, %v2791_v15   ;;  %v719_v3 = vpop.permute.xlu2 %718  ;;  %v123_v15 = vld [vmem:[%s3373_s11] sm:$0x1] }
 0x106   :  { %v801_v32 = vmul.f32 %v2691_v45, %v719_v3 }
 0x108   :  { %398 = vperm.xlu2 %2228, %v263_v5  }
 0x109   :  { %v711_v7 = vpop.permute.xlu1 %710 }
 0x10a   :  { %v799_v9 = vmul.f32 %v2691_v45, %v711_v7 }
 0x10c   :  { %v831_v11 = vadd.f32 %v799_v9, %v638_v8 }
 0x10d   :  { %2230 = vset.pattern.permute.xlu1 %v2490_v2  ;;  %v723_v12 = vpop.permute.xlu2 %722 }
 0x10e   :  { %565 = vperm.xlu1 %2230, %v263_v5   ;;  %v867_v16 = vadd.f32 %v2697_v53, %v831_v11  ;;  %v802_v49 = vmul.f32 %v2691_v45, %v723_v12 }
 0x110   :  { %v145_v17 = vpop.f32.mrf.mxu1  ;;  %2018 = vmatmul.msk.f32.gmra.mxu1 %vm124_vm1, %v867_v16  ;;  %2231 = vset.pattern.permute.xlu2 %v2488_v0 }
 0x111   :  { %v146_v18 = vadd.f32 %v145_v17, %v123_v15  ;;  %v715_v19 = vpop.permute.xlu1 %714  ;;  %758 = vperm.xlu2 %2231, %v263_v5  }
 0x112   :  { %v800_v21 = vmul.f32 %v2691_v45, %v715_v19 }
 0x113   :  { %2248 = vtanh.f32 %v146_v18 }
 0x114   :  { %v832_v23 = vadd.f32 %v800_v21, %v639_v20  ;;  %v542_v20 = vpop.permute.xlu0 %541 }
 0x116   :  { %569 = vperm.xlu1 %2230, %v2820_v43   ;;  %v868_v25 = vadd.f32 %v2697_v53, %v832_v23  ;;  %v534_v26 = vpop.permute.xlu2 %533 }
 0x117   :  { %v610_v60 = vmul.f32 %v2676_v38, %v534_v26  ;;  %v612_v26 = vmul.f32 %v2676_v38, %v542_v20 }
 0x118   :  { %v1007_v27 = vpop.f32.mrf.mxu1  ;;  %2019 = vmatmul.msk.f32.gmra.mxu1 %vm124_vm1, %v868_v25 }
 0x119   :  { %v2249_v28 = vpop.eup %2248  ;;  %v1008_v29 = vadd.f32 %v2885_v24, %v1007_v27  ;;  %762 = vperm.xlu2 %2231, %v2820_v43   ;;  %v448_v43 = vmul.f32 %v2674_v35, %v354_v36 }
 0x11a   :  { %1997 = vmatmul.msk.f32.vlgmr.msra.gmra.mxu2 %vm124_vm1, %v2249_v28  ;;  %v526_v30 = vpop.permute.xlu1 %525 }
 0x11b   :  { %2250 = vtanh.f32 %v1008_v29  ;;  %v608_v33 = vmul.f32 %v2676_v38, %v526_v30 }
 0x11d   :  { %v640_v34 = vadd.f32 %v608_v33, %v447_v31 }
 0x11e   :  { %2233 = vset.pattern.permute.xlu1 %v2489_v1  ;;  %v538_v37 = vpop.permute.xlu2 %537 }
 0x11f   :  { %v833_v39 = vadd.f32 %v801_v32, %v640_v34  ;;  %408 = vperm.xlu1 %2233, %v2850_v61   ;;  %v611_v16 = vmul.f32 %v2676_v38, %v538_v37 }
 0x120   :  { %v1010_v40 = vpop.f32.mrf.mxu1 }
 0x121   :  { %v2251_v41 = vpop.eup %2250  ;;  %v1011_v42 = vadd.f32 %v2885_v24, %v1010_v40  ;;  %v869_v44 = vadd.f32 %v2697_v53, %v833_v39  ;;  %2234 = vset.pattern.permute.xlu2 %v2490_v2 }
 0x122   :  { %2042 = vmatmul.msk.f32.vlgmr.msrb.gmra.mxu2 %vm124_vm1, %v2251_v41  ;;  %v530_v46 = vpop.permute.xlu1 %529  ;;  %573 = vperm.xlu2 %2234, %v2850_v61  }
 0x123   :  { %2252 = vtanh.f32 %v1011_v42  ;;  %v609_v47 = vmul.f32 %v2676_v38, %v530_v46  ;;  %2020 = vmatmul.msk.f32.gmra.mxu1 %vm124_vm1, %v869_v44 }
 0x125   :  { %v641_v50 = vadd.f32 %v609_v47, %v448_v43 }
 0x127   :  { %v834_v51 = vadd.f32 %v802_v49, %v641_v50  ;;  %413 = vperm.xlu1 %2233, %v266_v48   ;;  %v369_v52 = vpop.permute.xlu2 %368 }
 0x128   :  { %v1013_v54 = vpop.f32.mrf.mxu1  ;;  %v451_v25 = vmul.f32 %v2674_v35, %v369_v52 }
 0x129   :  { %v2253_v55 = vpop.eup %2252  ;;  %v1014_v56 = vadd.f32 %v2885_v24, %v1013_v54  ;;  %v870_v57 = vadd.f32 %v2697_v53, %v834_v51 }
 0x12a   :  { %2043 = vmatmul.msk.f32.gmra.mxu2 %vm124_vm1, %v2253_v55  ;;  %577 = vperm.xlu2 %2234, %v266_v48  }
 0x12b   :  { %2254 = vtanh.f32 %v1014_v56  ;;  %v359_v61 = vpop.permute.xlu1 %358  ;;  %2021 = vmatmul.msk.f32.gmra.mxu1 %vm124_vm1, %v870_v57 }
 0x12c   :  { %v449_v62 = vmul.f32 %v2674_v35, %v359_v61 }
 0x12e   :  { %v642_v3 = vadd.f32 %v610_v60, %v449_v62 }
 0x12f   :  { %2236 = vset.pattern.permute.xlu1 %v2488_v0  ;;  %v374_v4 = vpop.permute.xlu2 %373 }
 0x130   :  { %v835_v5 = vadd.f32 %v803_v63, %v642_v3  ;;  %v1016_v6 = vpop.f32.mrf.mxu1  ;;  %770 = vperm.xlu1 %2236, %v266_v48   ;;  %v452_v40 = vmul.f32 %v2674_v35, %v374_v4  ;;  %v379_v48 = vpop.permute.xlu0 %378 }
 0x131   :  { %v2255_v7 = vpop.eup %2254  ;;  %v1017_v8 = vadd.f32 %v2885_v24, %v1016_v6  ;;  %v453_v50 = vmul.f32 %v2674_v35, %v379_v48  ;;  %v2000_v48 = vld [vmem:[%s3372_s10 + $0x50] sm:$0xff] }
 0x132   :  { %2044 = vmatmul.msk.f32.gmra.mxu2 %vm124_vm1, %v2255_v7  ;;  %v871_v9 = vadd.f32 %v2697_v53, %v835_v5  ;;  %2237 = vset.pattern.permute.xlu2 %v2489_v1  ;;  %v268_v1 = vld [vmem:[%s3362_s0 + $0xf0] sm:$0xff] }
 0x133   :  { %2256 = vtanh.f32 %v1017_v8  ;;  %v364_v10 = vpop.permute.xlu1 %363  ;;  %418 = vperm.xlu2 %2237, %v2879_v22  }
 0x134   :  { %2022 = vmatmul.msk.f32.gmra.mxu1 %vm124_vm1, %v871_v9  ;;  %v450_v13 = vmul.f32 %v2674_v35, %v364_v10 }
 0x136   :  { %v643_v18 = vadd.f32 %v611_v16, %v450_v13 }
 0x138   :  { %v1019_v11 = vpop.f32.mrf.mxu1  ;;  %774 = vperm.xlu1 %2236, %v2879_v22   ;;  %v739_v15 = vpop.permute.xlu2 %738 }
 0x139   :  { %v2257_v12 = vpop.eup %2256  ;;  %v1020_v14 = vadd.f32 %v2885_v24, %v1019_v11  ;;  %v806_v41 = vmul.f32 %v2691_v45, %v739_v15  ;;  %v747_v63 = vpop.permute.xlu0 %746 }
 0x13a   :  { %2045 = vmatmul.msk.f32.gmra.mxu2 %vm124_vm1, %v2257_v12  ;;  %v808_v6 = vmul.f32 %v2691_v45, %v747_v63 }
 0x13b   :  { %2258 = vtanh.f32 %v1020_v14  ;;  %423 = vperm.xlu2 %2237, %v268_v1  }
 0x13c   :  { %v731_v17 = vpop.permute.xlu1 %730 }
 0x13d   :  { %v804_v19 = vmul.f32 %v2691_v45, %v731_v17 }
 0x13f   :  { %v836_v21 = vadd.f32 %v804_v19, %v643_v18 }
 0x140   :  { %v1022_v22 = vpop.f32.mrf.mxu1  ;;  %2239 = vset.pattern.permute.xlu1 %v2490_v2  ;;  %v743_v29 = vpop.permute.xlu2 %742  ;;  %v644_v2 = vadd.f32 %v612_v26, %v451_v25 }
 0x141   :  { %v2259_v23 = vpop.eup %2258  ;;  %v1023_v27 = vadd.f32 %v2885_v24, %v1022_v22  ;;  %585 = vperm.xlu1 %2239, %v268_v1   ;;  %v872_v28 = vadd.f32 %v2697_v53, %v836_v21  ;;  %v807_v56 = vmul.f32 %v2691_v45, %v743_v29 }
 0x142   :  { %2046 = vmatmul.msk.f32.gmra.mxu2 %vm124_vm1, %v2259_v23  ;;  %v562_v23 = vpop.permute.xlu0 %561 }
 0x143   :  { %2260 = vtanh.f32 %v1023_v27  ;;  %2023 = vmatmul.msk.f32.gmra.mxu1 %vm124_vm1, %v872_v28  ;;  %2240 = vset.pattern.permute.xlu2 %v2488_v0  ;;  %v617_v28 = vmul.f32 %v2676_v38, %v562_v23 }
 0x144   :  { %v735_v30 = vpop.permute.xlu1 %734  ;;  %778 = vperm.xlu2 %2240, %v268_v1  }
 0x145   :  { %v805_v31 = vmul.f32 %v2691_v45, %v735_v30 }
 0x147   :  { %v837_v32 = vadd.f32 %v805_v31, %v644_v2 }
 0x148   :  { %v1025_v33 = vpop.f32.mrf.mxu1 }
 0x149   :  { %v2261_v34 = vpop.eup %2260  ;;  %v1026_v36 = vadd.f32 %v2885_v24, %v1025_v33  ;;  %589 = vperm.xlu1 %2239, %v2916_v59   ;;  %v873_v37 = vadd.f32 %v2697_v53, %v837_v32  ;;  %v554_v39 = vpop.permute.xlu2 %553 }
 0x14a   :  { %2047 = vmatmul.msk.f32.gmra.mxu2 %vm124_vm1, %v2261_v34  ;;  %v615_v3 = vmul.f32 %v2676_v38, %v554_v39 }
 0x14b   :  { %2262 = vtanh.f32 %v1026_v36  ;;  %2024 = vmatmul.msk.f32.gmra.mxu1 %vm124_vm1, %v873_v37 }
 0x14c   :  { %782 = vperm.xlu2 %2240, %v2916_v59  }
 0x14d   :  { %v546_v0 = vpop.permute.xlu1 %545 }
 0x14e   :  { %v613_v42 = vmul.f32 %v2676_v38, %v546_v0 }
 0x150   :  { %v645_v43 = vadd.f32 %v613_v42, %v452_v40  ;;  %v1028_v44 = vpop.f32.mrf.mxu1  ;;  %v2001_v42 = vld [vmem:[%s3372_s10 + $0x58] sm:$0xff] }
 0x151   :  { %v2263_v46 = vpop.eup %2262  ;;  %v1029_v47 = vadd.f32 %v2885_v24, %v1028_v44  ;;  %v558_v55 = vpop.permute.xlu2 %557  ;;  %202 = vmatpush.msra.mxu3 %v2001_v42 }
 0x152   :  { %v838_v49 = vadd.f32 %v806_v41, %v645_v43  ;;  %2048 = vmatmul.msk.f32.gmra.mxu2 %vm124_vm1, %v2263_v46  ;;  %v616_v18 = vmul.f32 %v2676_v38, %v558_v55 }
 0x153   :  { %2264 = vtanh.f32 %v1029_v47  ;;  %203 = vmatpush.msra.mxu3 %v2000_v48 }
 0x154   :  { %v874_v51 = vadd.f32 %v2697_v53, %v838_v49 }
 0x155   :  { %v550_v52 = vpop.permute.xlu1 %549 }
 0x156   :  { %v614_v54 = vmul.f32 %v2676_v38, %v550_v52  ;;  %2025 = vmatmul.msk.f32.gmra.mxu1 %vm124_vm1, %v874_v51  ;;  %v404_v51 = vpop.permute.xlu0 %403 }
 0x158   :  { %v646_v57 = vadd.f32 %v614_v54, %v453_v50  ;;  %v1999_v50 = vld [vmem:[%s3372_s10 + $0x48] sm:$0xff]  ;;  %v1998_v54 = vld [vmem:[%s3372_s10 + $0x40] sm:$0xff] }
 0x159   :  { %v2265_v58 = vpop.eup %2264  ;;  %204 = vmatpush.msra.mxu3 %v1999_v50 }
 0x15a   :  { %v839_v59 = vadd.f32 %v807_v56, %v646_v57  ;;  %2049 = vmatmul.msk.f32.gmra.mxu2 %vm124_vm1, %v2265_v58  ;;  %v1031_v60 = vpop.f32.mrf.mxu1  ;;  %v394_v8 = vpop.permute.xlu2 %393  ;;  %v458_v57 = vmul.f32 %v2674_v35, %v404_v51  ;;  %v2077_v58 = vld [vmem:[%s3366_s4 + $0x58] sm:$0xff] }
 0x15b   :  { %v1032_v61 = vadd.f32 %v2885_v24, %v1031_v60  ;;  %v456_v26 = vmul.f32 %v2674_v35, %v394_v8  ;;  %205 = vmatpush.msra.mxu3 %v1998_v54 }
 0x15c   :  { %v875_v62 = vadd.f32 %v2697_v53, %v839_v59 }
 0x15d   :  { %2266 = vtanh.f32 %v1032_v61  ;;  %v649_v33 = vadd.f32 %v617_v28, %v456_v26  ;;  %1504 = vmatpush.msrb.mxu3 %v2077_v58 }
 0x15e   :  { %v384_v4 = vpop.permute.xlu1 %383  ;;  %2026 = vmatmul.msk.f32.gmra.mxu1 %vm124_vm1, %v875_v62  ;;  %v2076_v62 = vld [vmem:[%s3366_s4 + $0x50] sm:$0xff] }
 0x15f   :  { %v454_v5 = vmul.f32 %v2674_v35, %v384_v4  ;;  %1505 = vmatpush.msrb.mxu3 %v2076_v62  ;;  %v2075_v4 = vld [vmem:[%s3366_s4 + $0x48] sm:$0xff] }
 0x161   :  { %v647_v7 = vadd.f32 %v615_v3, %v454_v5  ;;  %1506 = vmatpush.msrb.mxu3 %v2075_v4 }
 0x162   :  { %v1034_v9 = vpop.f32.mrf.mxu1  ;;  %v399_v1 = vpop.permute.xlu2 %398 }
 0x163   :  { %v2267_v10 = vpop.eup %2266  ;;  %v840_v11 = vadd.f32 %v808_v6, %v647_v7  ;;  %v1035_v12 = vadd.f32 %v2885_v24, %v1034_v9  ;;  %v457_v44 = vmul.f32 %v2674_v35, %v399_v1  ;;  %v2074_v7 = vld [vmem:[%s3366_s4 + $0x40] sm:$0xff] }
 0x164   :  { %2050 = vmatmul.msk.f32.gmra.mxu2 %vm124_vm1, %v2267_v10  ;;  %1507 = vmatpush.msrb.mxu3 %v2074_v7  ;;  %v767_v10 = vpop.permute.xlu0 %766 }
 0x165   :  { %2268 = vtanh.f32 %v1035_v12  ;;  %v876_v13 = vadd.f32 %v2697_v53, %v840_v11 }
 0x166   :  { %v389_v14 = vpop.permute.xlu1 %388 }
 0x167   :  { %2027 = vmatmul.msk.f32.gmra.mxu1 %vm124_vm1, %v876_v13  ;;  %v455_v16 = vmul.f32 %v2674_v35, %v389_v14  ;;  %v813_v14 = vmul.f32 %v2691_v45, %v767_v10 }
 0x169   :  { %v648_v21 = vadd.f32 %v616_v18, %v455_v16 }
 0x16b   :  { %v2269_v15 = vpop.eup %2268  ;;  %v759_v30 = vpop.permute.xlu2 %758 }
 0x16c   :  { %2051 = vmatmul.msk.f32.gmra.mxu2 %vm124_vm1, %v2269_v15  ;;  %v811_v46 = vmul.f32 %v2691_v45, %v759_v30 }
 0x16d   :  { %v1037_v17 = vpop.f32.mrf.mxu1 }
 0x16e   :  { %v1038_v19 = vadd.f32 %v2885_v24, %v1037_v17 }
 0x16f   :  { %v751_v20 = vpop.permute.xlu1 %750 }
 0x170   :  { %2270 = vtanh.f32 %v1038_v19  ;;  %v809_v22 = vmul.f32 %v2691_v45, %v751_v20 }
 0x172   :  { %v841_v25 = vadd.f32 %v809_v22, %v648_v21  ;;  %v1996_v22 = vld [vmem:[%s3373_s11 + $0x1] sm:$0x1] }
 0x173   :  { %v763_v41 = vpop.permute.xlu2 %762 }
 0x174   :  { %v877_v27 = vadd.f32 %v2697_v53, %v841_v25  ;;  %v812_v63 = vmul.f32 %v2691_v45, %v763_v41 }
 0x175   :  { %v1040_v29 = vpop.f32.mrf.mxu1 }
 0x176   :  { %v2271_v2 = vpop.eup %2270  ;;  %v1041_v31 = vadd.f32 %v2885_v24, %v1040_v29  ;;  %2028 = vmatmul.msk.f32.gmra.mxu1 %vm124_vm1, %v877_v27 }
 0x177   :  { %v755_v32 = vpop.permute.xlu1 %754  ;;  %2052 = vmatmul.msk.f32.gmra.mxu2 %vm124_vm1, %v2271_v2 }
 0x178   :  { %2272 = vtanh.f32 %v1041_v31  ;;  %v810_v34 = vmul.f32 %v2691_v45, %v755_v32  ;;  %v3046_v32 = vld [vmem:[%s3367_s5 + $0x1] ss:$0 sm:$0xff] }
 0x17a   :  { %v842_v36 = vadd.f32 %v810_v34, %v649_v33 }
 0x17c   :  { %v878_v37 = vadd.f32 %v2697_v53, %v842_v36  ;;  %v574_v61 = vpop.permute.xlu2 %573  ;;  %v582_v36 = vpop.permute.xlu0 %581 }
 0x17d   :  { %v620_v11 = vmul.f32 %v2676_v38, %v574_v61 }
 0x17e   :  { %v2273_v0 = vpop.eup %2272  ;;  %v1043_v39 = vpop.f32.mrf.mxu1  ;;  %2029 = vmatmul.msk.f32.gmra.mxu1 %vm124_vm1, %v878_v37 }
 0x17f   :  { %v1044_v40 = vadd.f32 %v2885_v24, %v1043_v39  ;;  %2053 = vmatmul.msk.f32.gmra.mxu2 %vm124_vm1, %v2273_v0 }
 0x180   :  { %v566_v43 = vpop.permute.xlu1 %565 }
 0x181   :  { %2274 = vtanh.f32 %v1044_v40  ;;  %v618_v47 = vmul.f32 %v2676_v38, %v566_v43 }
 0x183   :  { %v650_v49 = vadd.f32 %v618_v47, %v457_v44  ;;  %v622_v44 = vmul.f32 %v2676_v38, %v582_v36 }
 0x184   :  { %v578_v15 = vpop.permute.xlu2 %577 }
 0x185   :  { %v843_v52 = vadd.f32 %v811_v46, %v650_v49  ;;  %v621_v30 = vmul.f32 %v2676_v38, %v578_v15 }
 0x187   :  { %v2275_v55 = vpop.eup %2274  ;;  %v879_v56 = vadd.f32 %v2697_v53, %v843_v52 }
 0x188   :  { %v570_v59 = vpop.permute.xlu1 %569  ;;  %2054 = vmatmul.msk.f32.gmra.mxu2 %vm124_vm1, %v2275_v55 }
 0x189   :  { %v619_v60 = vmul.f32 %v2676_v38, %v570_v59  ;;  %2030 = vmatmul.msk.f32.gmra.mxu1 %vm124_vm1, %v879_v56  ;;  %v2380_v56 = vld [vmem:[#allocation5] ss:$0 sm:$0xff] }
 0x18b   :  { %v651_v3 = vadd.f32 %v619_v60, %v458_v57 }
 0x18d   :  { %v844_v5 = vadd.f32 %v812_v63, %v651_v3  ;;  %v1046_v6 = vpop.f32.mrf.mxu1  ;;  %v419_v23 = vpop.permute.xlu2 %418 }
 0x18e   :  { %v1047_v8 = vadd.f32 %v2885_v24, %v1046_v6  ;;  %v461_v41 = vmul.f32 %v2674_v35, %v419_v23 }
 0x18f   :  { %v880_v9 = vadd.f32 %v2697_v53, %v844_v5 }
 0x190   :  { %2276 = vtanh.f32 %v1047_v8  ;;  %v654_v50 = vadd.f32 %v622_v44, %v461_v41 }
 0x191   :  { %v409_v12 = vpop.permute.xlu1 %408  ;;  %2031 = vmatmul.msk.f32.gmra.mxu1 %vm124_vm1, %v880_v9  ;;  %v429_v9 = vpop.permute.xlu0 %428 }
 0x192   :  { %v459_v13 = vmul.f32 %v2674_v35, %v409_v12 }
 0x194   :  { %v652_v1 = vadd.f32 %v620_v11, %v459_v13  ;;  %v463_v13 = vmul.f32 %v2674_v35, %v429_v9 }
 0x195   :  { %v1049_v16 = vpop.f32.mrf.mxu1  ;;  %v424_v43 = vpop.permute.xlu2 %423 }
 0x196   :  { %v2277_v17 = vpop.eup %2276  ;;  %v845_v18 = vadd.f32 %v813_v14, %v652_v1  ;;  %v1050_v19 = vadd.f32 %v2885_v24, %v1049_v16  ;;  %v462_v63 = vmul.f32 %v2674_v35, %v424_v43 }
 0x197   :  { %2055 = vmatmul.msk.f32.gmra.mxu2 %vm124_vm1, %v2277_v17 }
 0x198   :  { %v881_v20 = vadd.f32 %v2697_v53, %v845_v18  ;;  %2278 = vtanh.f32 %v1050_v19 }
 0x199   :  { %v414_v21 = vpop.permute.xlu1 %413 }
 0x19a   :  { %2032 = vmatmul.msk.f32.gmra.mxu1 %vm124_vm1, %v881_v20  ;;  %v460_v28 = vmul.f32 %v2674_v35, %v414_v21 }
 0x19c   :  { %v653_v33 = vadd.f32 %v621_v30, %v460_v28 }
 0x19d   :  { %v176_v25 = vpop.f32.mrf.mxu2 }
 0x19e   :  { %v2279_v26 = vpop.eup %2278  ;;  %v177_v27 = vadd.f32 %v1996_v22, %v176_v25  ;;  %v779_v59 = vpop.permute.xlu2 %778 }
 0x19f   :  { %2056 = vmatmul.msk.f32.gmra.mxu2 %vm124_vm1, %v2279_v26  ;;  %v816_v3 = vmul.f32 %v2691_v45, %v779_v59 }
 0x1a0   :  { %2280 = vtanh.f32 %v177_v27  ;;  %v1052_v29 = vpop.f32.mrf.mxu1 }
 0x1a1   :  { %v1053_v2 = vadd.f32 %v2885_v24, %v1052_v29 }
 0x1a2   :  { %v771_v31 = vpop.permute.xlu1 %770 }
 0x1a3   :  { %2282 = vtanh.f32 %v1053_v2  ;;  %v814_v34 = vmul.f32 %v2691_v45, %v771_v31 }
 0x1a5   :  { %v846_v37 = vadd.f32 %v814_v34, %v653_v33  ;;  %v1258_v0 = vpop.f32.mrf.mxu2 }
 0x1a6   :  { %v2281_v39 = vpop.eup %2280  ;;  %v1259_v40 = vadd.f32 %v3046_v32, %v1258_v0  ;;  %v783_v14 = vpop.permute.xlu2 %782 }
 0x1a7   :  { %v882_v42 = vadd.f32 %v2697_v53, %v846_v37  ;;  %2003 = vmatmul.msk.f32.vlgmr.msra.gmra.mxu3 %vm124_vm1, %v2281_v39  ;;  %v817_v18 = vmul.f32 %v2691_v45, %v783_v14  ;;  %v210_v14 = vld [vmem:[%s3374_s12] sm:$0xff] }
 0x1a8   :  { %2284 = vtanh.f32 %v1259_v40  ;;  %v1055_v46 = vpop.f32.mrf.mxu1 }
 0x1a9   :  { %v2283_v47 = vpop.eup %2282  ;;  %v1056_v48 = vadd.f32 %v2885_v24, %v1055_v46  ;;  %2033 = vmatmul.msk.f32.gmra.mxu1 %vm124_vm1, %v882_v42 }
 0x1aa   :  { %v775_v49 = vpop.permute.xlu1 %774  ;;  %2057 = vmatmul.msk.f32.gmra.mxu2 %vm124_vm1, %v2283_v47 }
 0x1ab   :  { %2286 = vtanh.f32 %v1056_v48  ;;  %v815_v51 = vmul.f32 %v2691_v45, %v775_v49 }
 0x1ad   :  { %v847_v53 = vadd.f32 %v815_v51, %v654_v50  ;;  %v1261_v52 = vpop.f32.mrf.mxu2 }
 0x1ae   :  { %v2285_v54 = vpop.eup %2284  ;;  %v1262_v55 = vadd.f32 %v3046_v32, %v1261_v52 }
 0x1af   :  { %v883_v57 = vadd.f32 %v2380_v56, %v847_v53  ;;  %2079 = vmatmul.msk.f32.vlgmr.msrb.gmra.mxu3 %vm124_vm1, %v2285_v54 }
 0x1b0   :  { %2288 = vtanh.f32 %v1262_v55 }
 0x1b1   :  { %v2287_v58 = vpop.eup %2286  ;;  %v1058_v60 = vpop.f32.mrf.mxu1  ;;  %2034 = vmatmul.msk.f32.gmra.mxu1 %vm124_vm1, %v883_v57 }
 0x1b2   :  { %v1059_v61 = vadd.f32 %v2885_v24, %v1058_v60  ;;  %2058 = vmatmul.msk.f32.gmra.mxu2 %vm124_vm1, %v2287_v58 }
 0x1b3   :  { %v586_v62 = vpop.permute.xlu1 %585 }
 0x1b4   :  { %2290 = vtanh.f32 %v1059_v61  ;;  %v623_v4 = vmul.f32 %v2676_v38, %v586_v62 }
 0x1b5   :  { %v1264_v5 = vpop.f32.mrf.mxu2 }
 0x1b6   :  { %v2289_v6 = vpop.eup %2288  ;;  %v655_v7 = vadd.f32 %v623_v4, %v462_v63  ;;  %v1265_v8 = vadd.f32 %v3046_v32, %v1264_v5 }
 0x1b7   :  { %2080 = vmatmul.msk.f32.gmra.mxu3 %vm124_vm1, %v2289_v6 }
 0x1b8   :  { %v848_v10 = vadd.f32 %v816_v3, %v655_v7  ;;  %2292 = vtanh.f32 %v1265_v8  ;;  %v213_v7 = vld [vmem:[%s3374_s12 + $0x18] sm:$0xff] }
 0x1b9   :  { %230 = vmatpush.msrb.mxu0 %v213_v7 }
 0x1ba   :  { %v2291_v11 = vpop.eup %2290  ;;  %v884_v12 = vadd.f32 %v2380_v56, %v848_v10  ;;  %v212_v10 = vld [vmem:[%s3374_s12 + $0x10] sm:$0xff] }
 0x1bb   :  { %v590_v15 = vpop.permute.xlu1 %589  ;;  %2059 = vmatmul.msk.f32.gmra.mxu2 %vm124_vm1, %v2291_v11  ;;  %231 = vmatpush.msrb.mxu0 %v212_v10  ;;  %v211_v11 = vld [vmem:[%s3374_s12 + $0x8] sm:$0xff] }
 0x1bc   :  { %v624_v1 = vmul.f32 %v2676_v38, %v590_v15  ;;  %2035 = vmatmul.msk.f32.gmra.mxu1 %vm124_vm1, %v884_v12 }
 0x1bd   :  { %v1267_v16 = vpop.f32.mrf.mxu2  ;;  %232 = vmatpush.msrb.mxu0 %v211_v11 }
 0x1be   :  { %v2293_v17 = vpop.eup %2292  ;;  %v656_v19 = vadd.f32 %v624_v1, %v463_v13  ;;  %v1268_v20 = vadd.f32 %v3046_v32, %v1267_v16  ;;  %v1608_v1 = vld [vmem:[%s3368_s6 + $0x18] sm:$0xff] }
 0x1bf   :  { %2081 = vmatmul.msk.f32.gmra.mxu3 %vm124_vm1, %v2293_v17  ;;  %233 = vmatpush.msrb.mxu0 %v210_v14 }
 0x1c0   :  { %v849_v21 = vadd.f32 %v817_v18, %v656_v19  ;;  %2294 = vtanh.f32 %v1268_v20  ;;  %v1061_v35 = vpop.f32.mrf.mxu1  ;;  %v1607_v19 = vld [vmem:[%s3368_s6 + $0x10] sm:$0xff]  ;;  %v1606_v20 = vld [vmem:[%s3368_s6 + $0x8] sm:$0xff] }
 0x1c1   :  { %v1062_v22 = vadd.f32 %v2885_v24, %v1061_v35  ;;  %1721 = vmatpush.msra.mxu0 %v1608_v1 }
 0x1c2   :  { %v885_v23 = vadd.f32 %v2380_v56, %v849_v21  ;;  %v1605_v21 = vld [vmem:[%s3368_s6] sm:$0xff] }
 0x1c3   :  { %2296 = vtanh.f32 %v1062_v22  ;;  %1722 = vmatpush.msra.mxu0 %v1607_v19 }
 0x1c4   :  { %2036 = vmatmul.msk.f32.gmra.mxu1 %vm124_vm1, %v885_v23 }
 0x1c5   :  { %v1270_v38 = vpop.f32.mrf.mxu2  ;;  %1723 = vmatpush.msra.mxu0 %v1606_v20 }
 0x1c6   :  { %v2295_v25 = vpop.eup %2294  ;;  %v1271_v26 = vadd.f32 %v3046_v32, %v1270_v38 }
 0x1c7   :  { %2082 = vmatmul.msk.f32.gmra.mxu3 %vm124_vm1, %v2295_v25  ;;  %1724 = vmatpush.msra.mxu0 %v1605_v21 }
 0x1c8   :  { %2298 = vtanh.f32 %v1271_v26  ;;  %v1064_v45 = vpop.f32.mrf.mxu1 }
 0x1c9   :  { %v2297_v27 = vpop.eup %2296  ;;  %v1065_v28 = vadd.f32 %v2885_v24, %v1064_v45 }
 0x1ca   :  { %2060 = vmatmul.msk.f32.gmra.mxu2 %vm124_vm1, %v2297_v27 }
 0x1cb   :  { %2300 = vtanh.f32 %v1065_v28 }
 0x1cd   :  { %v1273_v29 = vpop.f32.mrf.mxu2 }
 0x1ce   :  { %v2299_v30 = vpop.eup %2298  ;;  %v1274_v2 = vadd.f32 %v3046_v32, %v1273_v29 }
 0x1cf   :  { %2083 = vmatmul.msk.f32.gmra.mxu3 %vm124_vm1, %v2299_v30 }
 0x1d0   :  { %2302 = vtanh.f32 %v1274_v2 }
 0x1d1   :  { %v2301_v31 = vpop.eup %2300 }
 0x1d2   :  { %2061 = vmatmul.msk.f32.gmra.mxu2 %vm124_vm1, %v2301_v31  ;;  %v2002_v31 = vld [vmem:[%s3373_s11 + $0x2] sm:$0x1] }
 0x1d3   :  { %v1067_v33 = vpop.f32.mrf.mxu1 }
 0x1d4   :  { %v1068_v34 = vadd.f32 %v2885_v24, %v1067_v33 }
 0x1d5   :  { %v1276_v36 = vpop.f32.mrf.mxu2 }
 0x1d6   :  { %v2303_v37 = vpop.eup %2302  ;;  %2304 = vtanh.f32 %v1068_v34  ;;  %v1277_v0 = vadd.f32 %v3046_v32, %v1276_v36 }
 0x1d7   :  { %2084 = vmatmul.msk.f32.gmra.mxu3 %vm124_vm1, %v2303_v37 }
 0x1d8   :  { %2306 = vtanh.f32 %v1277_v0 }
 0x1db   :  { %v1070_v39 = vpop.f32.mrf.mxu1 }
 0x1dc   :  { %v2305_v40 = vpop.eup %2304  ;;  %v1071_v41 = vadd.f32 %v2885_v24, %v1070_v39 }
 0x1dd   :  { %v1279_v42 = vpop.f32.mrf.mxu2  ;;  %2062 = vmatmul.msk.f32.gmra.mxu2 %vm124_vm1, %v2305_v40 }
 0x1de   :  { %v2307_v43 = vpop.eup %2306  ;;  %2308 = vtanh.f32 %v1071_v41  ;;  %v1280_v44 = vadd.f32 %v3046_v32, %v1279_v42  ;;  %v3153_v42 = vld [vmem:[%s3367_s5 + $0x2] ss:$0 sm:$0xff] }
 0x1df   :  { %2085 = vmatmul.msk.f32.gmra.mxu3 %vm124_vm1, %v2307_v43 }
 0x1e0   :  { %2310 = vtanh.f32 %v1280_v44 }
 0x1e4   :  { %v2309_v46 = vpop.eup %2308  ;;  %v1073_v47 = vpop.f32.mrf.mxu1 }
 0x1e5   :  { %v1074_v48 = vadd.f32 %v2885_v24, %v1073_v47  ;;  %2063 = vmatmul.msk.f32.gmra.mxu2 %vm124_vm1, %v2309_v46 }
 0x1e6   :  { %v2311_v49 = vpop.eup %2310 }
 0x1e7   :  { %2312 = vtanh.f32 %v1074_v48  ;;  %2086 = vmatmul.msk.f32.gmra.mxu3 %vm124_vm1, %v2311_v49  ;;  %v1282_v50 = vpop.f32.mrf.mxu2 }
 0x1e8   :  { %v1283_v51 = vadd.f32 %v3046_v32, %v1282_v50 }
 0x1ea   :  { %2314 = vtanh.f32 %v1283_v51 }
 0x1ed   :  { %v2313_v53 = vpop.eup %2312 }
 0x1ee   :  { %2064 = vmatmul.msk.f32.gmra.mxu2 %vm124_vm1, %v2313_v53 }
 0x1ef   :  { %v1285_v52 = vpop.f32.mrf.mxu2 }
 0x1f0   :  { %v2315_v54 = vpop.eup %2314  ;;  %v1286_v55 = vadd.f32 %v3046_v32, %v1285_v52 }
 0x1f1   :  { %2087 = vmatmul.msk.f32.gmra.mxu3 %vm124_vm1, %v2315_v54 }
 0x1f2   :  { %2316 = vtanh.f32 %v1286_v55 }
 0x1f3   :  { %v1076_v56 = vpop.f32.mrf.mxu1 }
 0x1f4   :  { %v1077_v57 = vadd.f32 %v2885_v24, %v1076_v56 }
 0x1f6   :  { %2318 = vtanh.f32 %v1077_v57 }
 0x1f8   :  { %v2317_v58 = vpop.eup %2316 }
 0x1f9   :  { %2088 = vmatmul.msk.f32.gmra.mxu3 %vm124_vm1, %v2317_v58 }
 0x1fa   :  { %v1288_v59 = vpop.f32.mrf.mxu2 }
 0x1fb   :  { %v1289_v60 = vadd.f32 %v3046_v32, %v1288_v59  ;;  %v1079_v61 = vpop.f32.mrf.mxu1 }
 0x1fc   :  { %v2319_v62 = vpop.eup %2318  ;;  %v1080_v63 = vadd.f32 %v2885_v24, %v1079_v61 }
 0x1fd   :  { %2320 = vtanh.f32 %v1289_v60  ;;  %2065 = vmatmul.msk.f32.gmra.mxu2 %vm124_vm1, %v2319_v62 }
 0x1fe   :  { %2322 = vtanh.f32 %v1080_v63 }
 0x202   :  { %v1291_v3 = vpop.f32.mrf.mxu2 }
 0x203   :  { %v2321_v4 = vpop.eup %2320  ;;  %v1292_v5 = vadd.f32 %v3046_v32, %v1291_v3 }
 0x204   :  { %v2323_v6 = vpop.eup %2322  ;;  %2089 = vmatmul.msk.f32.gmra.mxu3 %vm124_vm1, %v2321_v4 }
 0x205   :  { %2324 = vtanh.f32 %v1292_v5  ;;  %2066 = vmatmul.msk.f32.gmra.mxu2 %vm124_vm1, %v2323_v6 }
 0x206   :  { %v1082_v8 = vpop.f32.mrf.mxu1 }
 0x207   :  { %v1083_v9 = vadd.f32 %v2885_v24, %v1082_v8 }
 0x209   :  { %2326 = vtanh.f32 %v1083_v9 }
 0x20b   :  { %v2325_v12 = vpop.eup %2324  ;;  %v1294_v13 = vpop.f32.mrf.mxu2 }
 0x20c   :  { %v1295_v15 = vadd.f32 %v3046_v32, %v1294_v13  ;;  %2090 = vmatmul.msk.f32.gmra.mxu3 %vm124_vm1, %v2325_v12 }
 0x20e   :  { %2328 = vtanh.f32 %v1295_v15  ;;  %v1085_v16 = vpop.f32.mrf.mxu1 }
 0x20f   :  { %v2327_v17 = vpop.eup %2326  ;;  %v1086_v18 = vadd.f32 %v2885_v24, %v1085_v16 }
 0x210   :  { %2067 = vmatmul.msk.f32.gmra.mxu2 %vm124_vm1, %v2327_v17 }
 0x211   :  { %2330 = vtanh.f32 %v1086_v18 }
 0x214   :  { %v2329_v35 = vpop.eup %2328 }
 0x215   :  { %2091 = vmatmul.msk.f32.gmra.mxu3 %vm124_vm1, %v2329_v35 }
 0x217   :  { %v2331_v22 = vpop.eup %2330  ;;  %v1088_v23 = vpop.f32.mrf.mxu1 }
 0x218   :  { %v1089_v38 = vadd.f32 %v2885_v24, %v1088_v23  ;;  %2068 = vmatmul.msk.f32.gmra.mxu2 %vm124_vm1, %v2331_v22 }
 0x21a   :  { %2332 = vtanh.f32 %v1089_v38  ;;  %v1297_v25 = vpop.f32.mrf.mxu2 }
 0x21b   :  { %v1298_v26 = vadd.f32 %v3046_v32, %v1297_v25 }
 0x21d   :  { %2334 = vtanh.f32 %v1298_v26 }
 0x220   :  { %v2333_v45 = vpop.eup %2332 }
 0x221   :  { %2069 = vmatmul.msk.f32.gmra.mxu2 %vm124_vm1, %v2333_v45 }
 0x222   :  { %v1300_v27 = vpop.f32.mrf.mxu2 }
 0x223   :  { %v2335_v28 = vpop.eup %2334  ;;  %v1301_v29 = vadd.f32 %v3046_v32, %v1300_v27 }
 0x224   :  { %2092 = vmatmul.msk.f32.gmra.mxu3 %vm124_vm1, %v2335_v28 }
 0x225   :  { %2336 = vtanh.f32 %v1301_v29 }
 0x226   :  { %v1091_v30 = vpop.f32.mrf.mxu1 }
 0x227   :  { %v1092_v2 = vadd.f32 %v2885_v24, %v1091_v30 }
 0x229   :  { %2338 = vtanh.f32 %v1092_v2 }
 0x22a   :  { %v207_v33 = vpop.f32.mrf.mxu3 }
 0x22b   :  { %v2337_v34 = vpop.eup %2336  ;;  %v208_v36 = vadd.f32 %v2002_v31, %v207_v33 }
 0x22c   :  { %2093 = vmatmul.msk.f32.gmra.mxu3 %vm124_vm1, %v2337_v34 }
 0x22d   :  { %2004 = vmatmul.msk.f32.vlgmr.msrb.gmra.mxu0 %vm124_vm1, %v208_v36  ;;  %v1303_v37 = vpop.f32.mrf.mxu2 }
 0x22e   :  { %v1304_v0 = vadd.f32 %v3046_v32, %v1303_v37  ;;  %v1094_v39 = vpop.f32.mrf.mxu1 }
 0x22f   :  { %v2339_v40 = vpop.eup %2338  ;;  %v1095_v41 = vadd.f32 %v2885_v24, %v1094_v39 }
 0x230   :  { %2340 = vtanh.f32 %v1304_v0  ;;  %2070 = vmatmul.msk.f32.gmra.mxu2 %vm124_vm1, %v2339_v40 }
 0x231   :  { %2342 = vtanh.f32 %v1095_v41 }
 0x232   :  { %v1509_v43 = vpop.f32.mrf.mxu3 }
 0x233   :  { %v1510_v44 = vadd.f32 %v3153_v42, %v1509_v43 }
 0x235   :  { %2111 = vmatmul.msk.f32.vlgmr.msra.gmra.mxu0 %vm124_vm1, %v1510_v44  ;;  %v1306_v46 = vpop.f32.mrf.mxu2 }
 0x236   :  { %v2341_v47 = vpop.eup %2340  ;;  %v1307_v48 = vadd.f32 %v3046_v32, %v1306_v46 }
 0x237   :  { %v2343_v49 = vpop.eup %2342  ;;  %2094 = vmatmul.msk.f32.gmra.mxu3 %vm124_vm1, %v2341_v47 }
 0x238   :  { %2344 = vtanh.f32 %v1307_v48  ;;  %2071 = vmatmul.msk.f32.gmra.mxu2 %vm124_vm1, %v2343_v49 }
 0x239   :  { %v1097_v50 = vpop.f32.mrf.mxu1 }
 0x23a   :  { %v1098_v51 = vadd.f32 %v2885_v24, %v1097_v50  ;;  %v1512_v53 = vpop.f32.mrf.mxu3 }
 0x23b   :  { %v1513_v52 = vadd.f32 %v3153_v42, %v1512_v53 }
 0x23c   :  { %2346 = vtanh.f32 %v1098_v51 }
 0x23d   :  { %2112 = vmatmul.msk.f32.gmra.mxu0 %vm124_vm1, %v1513_v52 }
 0x23e   :  { %v2345_v54 = vpop.eup %2344  ;;  %v1309_v55 = vpop.f32.mrf.mxu2 }
 0x23f   :  { %v1310_v56 = vadd.f32 %v3046_v32, %v1309_v55  ;;  %2095 = vmatmul.msk.f32.gmra.mxu3 %vm124_vm1, %v2345_v54 }
 0x241   :  { %2348 = vtanh.f32 %v1310_v56  ;;  %v1100_v57 = vpop.f32.mrf.mxu1 }
 0x242   :  { %v2347_v58 = vpop.eup %2346  ;;  %v1101_v59 = vadd.f32 %v2885_v24, %v1100_v57  ;;  %v1515_v60 = vpop.f32.mrf.mxu3 }
 0x243   :  { %v1516_v61 = vadd.f32 %v3153_v42, %v1515_v60  ;;  %2072 = vmatmul.msk.f32.gmra.mxu2 %vm124_vm1, %v2347_v58 }
 0x244   :  { %2350 = vtanh.f32 %v1101_v59 }
 0x245   :  { %2113 = vmatmul.msk.f32.gmra.mxu0 %vm124_vm1, %v1516_v61 }
 0x247   :  { %v2349_v62 = vpop.eup %2348 }
 0x248   :  { %2096 = vmatmul.msk.f32.gmra.mxu3 %vm124_vm1, %v2349_v62 }
 0x24a   :  { %v2351_v63 = vpop.eup %2350  ;;  %v1518_v3 = vpop.f32.mrf.mxu3 }
 0x24b   :  { %v1519_v4 = vadd.f32 %v3153_v42, %v1518_v3  ;;  %2073 = vmatmul.msk.f32.gmra.mxu2 %vm124_vm1, %v2351_v63 }
 0x24d   :  { %2114 = vmatmul.msk.f32.gmra.mxu0 %vm124_vm1, %v1519_v4  ;;  %v1312_v24 = vpop.f32.mrf.mxu2 }
 0x24e   :  { %v1313_v5 = vadd.f32 %v3046_v32, %v1312_v24 }
 0x250   :  { %2352 = vtanh.f32 %v1313_v5 }
 0x252   :  { %v1521_v6 = vpop.f32.mrf.mxu3 }
 0x253   :  { %v1522_v7 = vadd.f32 %v3153_v42, %v1521_v6 }
 0x255   :  { %2115 = vmatmul.msk.f32.gmra.mxu0 %vm124_vm1, %v1522_v7  ;;  %v1315_v8 = vpop.f32.mrf.mxu2 }
 0x256   :  { %v2353_v9 = vpop.eup %2352  ;;  %v1316_v10 = vadd.f32 %v3046_v32, %v1315_v8 }
 0x257   :  { %2097 = vmatmul.msk.f32.gmra.mxu3 %vm124_vm1, %v2353_v9 }
 0x258   :  { %2354 = vtanh.f32 %v1316_v10 }
 0x25a   :  { %v1524_v11 = vpop.f32.mrf.mxu3 }
 0x25b   :  { %v1525_v12 = vadd.f32 %v3153_v42, %v1524_v11 }
 0x25d   :  { %2116 = vmatmul.msk.f32.gmra.mxu0 %vm124_vm1, %v1525_v12 }
 0x25e   :  { %v2355_v13 = vpop.eup %2354 }
 0x25f   :  { %2098 = vmatmul.msk.f32.gmra.mxu3 %vm124_vm1, %v2355_v13 }
 0x260   :  { %v1318_v14 = vpop.f32.mrf.mxu2 }
 0x261   :  { %v1319_v15 = vadd.f32 %v3046_v32, %v1318_v14 }
 0x262   :  { %v1527_v1 = vpop.f32.mrf.mxu3 }
 0x263   :  { %2356 = vtanh.f32 %v1319_v15  ;;  %v1528_v16 = vadd.f32 %v3153_v42, %v1527_v1 }
 0x265   :  { %2117 = vmatmul.msk.f32.gmra.mxu0 %vm124_vm1, %v1528_v16 }
 0x268   :  { %v1321_v17 = vpop.f32.mrf.mxu2 }
 0x269   :  { %v2357_v18 = vpop.eup %2356  ;;  %v1322_v19 = vadd.f32 %v3046_v32, %v1321_v17 }
 0x26a   :  { %v1530_v20 = vpop.f32.mrf.mxu3  ;;  %2099 = vmatmul.msk.f32.gmra.mxu3 %vm124_vm1, %v2357_v18 }
 0x26b   :  { %2358 = vtanh.f32 %v1322_v19  ;;  %v1531_v21 = vadd.f32 %v3153_v42, %v1530_v20 }
 0x26d   :  { %2118 = vmatmul.msk.f32.gmra.mxu0 %vm124_vm1, %v1531_v21 }
 0x271   :  { %v2359_v35 = vpop.eup %2358  ;;  %v1324_v22 = vpop.f32.mrf.mxu2 }
 0x272   :  { %v1325_v23 = vadd.f32 %v3046_v32, %v1324_v22  ;;  %2100 = vmatmul.msk.f32.gmra.mxu3 %vm124_vm1, %v2359_v35 }
 0x274   :  { %2360 = vtanh.f32 %v1325_v23  ;;  %v1533_v38 = vpop.f32.mrf.mxu3 }
 0x275   :  { %v1534_v25 = vadd.f32 %v3153_v42, %v1533_v38 }
 0x277   :  { %2119 = vmatmul.msk.f32.gmra.mxu0 %vm124_vm1, %v1534_v25 }
 0x27a   :  { %v2361_v26 = vpop.eup %2360 }
 0x27b   :  { %2101 = vmatmul.msk.f32.gmra.mxu3 %vm124_vm1, %v2361_v26 }
 0x27c   :  { %v1536_v45 = vpop.f32.mrf.mxu3 }
 0x27d   :  { %v1537_v27 = vadd.f32 %v3153_v42, %v1536_v45 }
 0x27f   :  { %2120 = vmatmul.msk.f32.gmra.mxu0 %vm124_vm1, %v1537_v27 }
 0x280   :  { %v1327_v28 = vpop.f32.mrf.mxu2 }
 0x281   :  { %v1328_v29 = vadd.f32 %v3046_v32, %v1327_v28 }
 0x283   :  { %2362 = vtanh.f32 %v1328_v29 }
 0x287   :  { %v1539_v30 = vpop.f32.mrf.mxu3 }
 0x288   :  { %v1540_v2 = vadd.f32 %v3153_v42, %v1539_v30  ;;  %v1330_v31 = vpop.f32.mrf.mxu2 }
 0x289   :  { %v2363_v33 = vpop.eup %2362  ;;  %v1331_v34 = vadd.f32 %v3046_v32, %v1330_v31 }
 0x28a   :  { %2102 = vmatmul.msk.f32.gmra.mxu3 %vm124_vm1, %v2363_v33  ;;  %2121 = vmatmul.msk.f32.gmra.mxu0 %vm124_vm1, %v1540_v2 }
 0x28b   :  { %2364 = vtanh.f32 %v1331_v34 }
 0x28f   :  { %v1542_v36 = vpop.f32.mrf.mxu3 }
 0x290   :  { %v1543_v37 = vadd.f32 %v3153_v42, %v1542_v36 }
 0x291   :  { %v2365_v0 = vpop.eup %2364 }
 0x292   :  { %2103 = vmatmul.msk.f32.gmra.mxu3 %vm124_vm1, %v2365_v0  ;;  %2122 = vmatmul.msk.f32.gmra.mxu0 %vm124_vm1, %v1543_v37 }
 0x293   :  { %v1333_v39 = vpop.f32.mrf.mxu2 }
 0x294   :  { %v1334_v40 = vadd.f32 %v3046_v32, %v1333_v39 }
 0x296   :  { %2366 = vtanh.f32 %v1334_v40 }
 0x298   :  { %v1545_v41 = vpop.f32.mrf.mxu3 }
 0x299   :  { %v1546_v43 = vadd.f32 %v3153_v42, %v1545_v41 }
 0x29b   :  { %v1336_v44 = vpop.f32.mrf.mxu2  ;;  %2123 = vmatmul.msk.f32.gmra.mxu0 %vm124_vm1, %v1546_v43 }
 0x29c   :  { %v2367_v46 = vpop.eup %2366  ;;  %v1337_v47 = vadd.f32 %v3046_v32, %v1336_v44 }
 0x29d   :  { %2104 = vmatmul.msk.f32.gmra.mxu3 %vm124_vm1, %v2367_v46 }
 0x29e   :  { %2368 = vtanh.f32 %v1337_v47  ;;  %v3269_v47 = vld [vmem:[%s3369_s7] ss:$0 sm:$0xff] }
 0x2a4   :  { %v2369_v48 = vpop.eup %2368  ;;  %v1339_v49 = vpop.f32.mrf.mxu2 }
 0x2a5   :  { %v1340_v50 = vadd.f32 %v3046_v32, %v1339_v49  ;;  %2105 = vmatmul.msk.f32.gmra.mxu3 %vm124_vm1, %v2369_v48 }
 0x2a7   :  { %2370 = vtanh.f32 %v1340_v50  ;;  %v1548_v51 = vpop.f32.mrf.mxu3 }
 0x2a8   :  { %v1549_v53 = vadd.f32 %v3153_v42, %v1548_v51 }
 0x2aa   :  { %v3212_v52 = vpop.f32.mrf.mxu0  ;;  %2124 = vmatmul.msk.f32.gmra.mxu0 %vm124_vm1, %v1549_v53 }
 0x2ad   :  { %v2371_v54 = vpop.eup %2370 }
 0x2ae   :  { %2106 = vmatmul.msk.f32.gmra.mxu3 %vm124_vm1, %v2371_v54 }
 0x2af   :  { %v1551_v55 = vpop.f32.mrf.mxu3 }
 0x2b0   :  { %v1552_v56 = vadd.f32 %v3153_v42, %v1551_v55 }
 0x2b2   :  { %v3217_v57 = vpop.f32.mrf.mxu0  ;;  %2125 = vmatmul.msk.f32.gmra.mxu0 %vm124_vm1, %v1552_v56 }
 0x2b3   :  { %v1342_v58 = vpop.f32.mrf.mxu2 }
 0x2b4   :  { %v1343_v59 = vadd.f32 %v3046_v32, %v1342_v58 }
 0x2b6   :  { %2372 = vtanh.f32 %v1343_v59 }
 0x2ba   :  { %v3221_v60 = vpop.f32.mrf.mxu0  ;;  %v1554_v61 = vpop.f32.mrf.mxu3 }
 0x2bb   :  { %v1555_v62 = vadd.f32 %v3153_v42, %v1554_v61  ;;  %v1345_v63 = vpop.f32.mrf.mxu2 }
 0x2bc   :  { %v2373_v3 = vpop.eup %2372  ;;  %v1346_v4 = vadd.f32 %v3046_v32, %v1345_v63 }
 0x2bd   :  { %2107 = vmatmul.msk.f32.gmra.mxu3 %vm124_vm1, %v2373_v3  ;;  %2126 = vmatmul.msk.f32.gmra.mxu0 %vm124_vm1, %v1555_v62 }
 0x2be   :  { %2374 = vtanh.f32 %v1346_v4 }
 0x2c2   :  { %v3227_v24 = vpop.f32.mrf.mxu0  ;;  %v1557_v5 = vpop.f32.mrf.mxu3 }
 0x2c3   :  { %v1558_v6 = vadd.f32 %v3153_v42, %v1557_v5 }
 0x2c4   :  { %v2375_v7 = vpop.eup %2374 }
 0x2c5   :  { %2108 = vmatmul.msk.f32.gmra.mxu3 %vm124_vm1, %v2375_v7  ;;  %2127 = vmatmul.msk.f32.gmra.mxu0 %vm124_vm1, %v1558_v6 }
 0x2c6   :  { %v1348_v8 = vpop.f32.mrf.mxu2 }
 0x2c7   :  { %v1349_v9 = vadd.f32 %v3046_v32, %v1348_v8 }
 0x2c9   :  { %2376 = vtanh.f32 %v1349_v9 }
 0x2ca   :  { %v3233_v10 = vpop.f32.mrf.mxu0 }
 0x2cb   :  { %v1560_v11 = vpop.f32.mrf.mxu3 }
 0x2cc   :  { %v1561_v12 = vadd.f32 %v3153_v42, %v1560_v11 }
 0x2ce   :  { %v1351_v13 = vpop.f32.mrf.mxu2  ;;  %2128 = vmatmul.msk.f32.gmra.mxu0 %vm124_vm1, %v1561_v12 }
 0x2cf   :  { %v2377_v14 = vpop.eup %2376  ;;  %v1352_v15 = vadd.f32 %v3046_v32, %v1351_v13 }
 0x2d0   :  { %2109 = vmatmul.msk.f32.gmra.mxu3 %vm124_vm1, %v2377_v14 }
 0x2d1   :  { %2378 = vtanh.f32 %v1352_v15  ;;  %v1733_v15 = vadd.f32 %v3269_v47, %v3227_v24 }
 0x2d2   :  { %v3239_v1 = vpop.f32.mrf.mxu0 }
 0x2d3   :  { %v1739_v14 = vadd.f32 %v3269_v47, %v3239_v1  ;;  %v214_v1 = vld [vmem:[%s3375_s13] sm:$0x1]  ;;  %s2491_s13 = smov [#allocation8]  }
 0x2d4   :  { %v236_v24 = vadd.f32 %v3212_v52, %v214_v1  ;;  %s1977_s25 = sshll.u32 %s2491_s13, 4  ;;  %s1978_s25 = int_to_ptr.vmem [resolvable:$true] %s1977_s25 }
 0x2d7   :  { %v2379_v16 = vpop.eup %2378 }
 0x2d8   :  { %2110 = vmatmul.msk.f32.gmra.mxu3 %vm124_vm1, %v2379_v16 }
 0x2da   :  { %v1563_v17 = vpop.f32.mrf.mxu3  ;;  %v3244_v19 = vpop.f32.mrf.mxu0 }
 0x2db   :  { %v1564_v18 = vadd.f32 %v3153_v42, %v1563_v17  ;;  %v1742_v12 = vadd.f32 %v3269_v47, %v3244_v19  ;;  %v1730_v17 = vadd.f32 %v3269_v47, %v3221_v60 }
 0x2dd   :  { %2129 = vmatmul.msk.f32.gmra.mxu0 %vm124_vm1, %v1564_v18 }
 0x2e2   :  { %v1566_v20 = vpop.f32.mrf.mxu3  ;;  %v3248_v32 = vpop.f32.mrf.mxu0 }
 0x2e3   :  { %v1567_v21 = vadd.f32 %v3153_v42, %v1566_v20  ;;  %v1745_v11 = vadd.f32 %v3269_v47, %v3248_v32 }
 0x2e5   :  { %2130 = vmatmul.msk.f32.gmra.mxu0 %vm124_vm1, %v1567_v21 }
 0x2ea   :  { %v1747_v23 = vpop.f32.mrf.mxu0 }
 0x2eb   :  { %v1748_v6 = vadd.f32 %v3269_v47, %v1747_v23 }
 0x2ed   :  { %v1569_v35 = vpop.f32.mrf.mxu3 }
 0x2ee   :  { %v1570_v22 = vadd.f32 %v3153_v42, %v1569_v35 }
 0x2f0   :  { %2131 = vmatmul.msk.f32.gmra.mxu0 %vm124_vm1, %v1570_v22 }
 0x2f4   :  { %v1750_v26 = vpop.f32.mrf.mxu0 }
 0x2f5   :  { %v1572_v38 = vpop.f32.mrf.mxu3  ;;  %v1751_v5 = vadd.f32 %v3269_v47, %v1750_v26 }
 0x2f6   :  { %v1573_v25 = vadd.f32 %v3153_v42, %v1572_v38 }
 0x2f8   :  { %2132 = vmatmul.msk.f32.gmra.mxu0 %vm124_vm1, %v1573_v25 }
 0x2fc   :  { %v1753_v28 = vpop.f32.mrf.mxu0 }
 0x2fd   :  { %v1754_v62 = vadd.f32 %v3269_v47, %v1753_v28 }
 0x2fe   :  { %v1575_v45 = vpop.f32.mrf.mxu3 }
 0x2ff   :  { %v1576_v27 = vadd.f32 %v3153_v42, %v1575_v45 }
 0x301   :  { %2133 = vmatmul.msk.f32.gmra.mxu0 %vm124_vm1, %v1576_v27 }
 0x307   :  { %v1756_v29 = vpop.f32.mrf.mxu0 }
 0x308   :  { %v1757_v61 = vadd.f32 %v3269_v47, %v1756_v29 }
 0x30d   :  { %v1578_v30 = vpop.f32.mrf.mxu3 }
 0x30e   :  { %v1579_v2 = vadd.f32 %v3153_v42, %v1578_v30 }
 0x30f   :  { %v1759_v33 = vpop.f32.mrf.mxu0 }
 0x310   :  { %2134 = vmatmul.msk.f32.gmra.mxu0 %vm124_vm1, %v1579_v2  ;;  %v1760_v59 = vadd.f32 %v3269_v47, %v1759_v33 }
 0x315   :  { %v1581_v31 = vpop.f32.mrf.mxu3 }
 0x316   :  { %v1582_v34 = vadd.f32 %v3153_v42, %v1581_v31 }
 0x318   :  { %2135 = vmatmul.msk.f32.gmra.mxu0 %vm124_vm1, %v1582_v34  ;;  %v1762_v36 = vpop.f32.mrf.mxu0 }
 0x319   :  { %v1763_v55 = vadd.f32 %v3269_v47, %v1762_v36 }
 0x320   :  { %v1584_v37 = vpop.f32.mrf.mxu3 }
 0x321   :  { %v1585_v0 = vadd.f32 %v3153_v42, %v1584_v37 }
 0x323   :  { %2136 = vmatmul.msk.f32.gmra.mxu0 %vm124_vm1, %v1585_v0 }
 0x327   :  { %v1765_v39 = vpop.f32.mrf.mxu0 }
 0x328   :  { %v1587_v40 = vpop.f32.mrf.mxu3  ;;  %v1766_v54 = vadd.f32 %v3269_v47, %v1765_v39 }
 0x329   :  { %v1588_v41 = vadd.f32 %v3153_v42, %v1587_v40 }
 0x32b   :  { %2137 = vmatmul.msk.f32.gmra.mxu0 %vm124_vm1, %v1588_v41  ;;  %v1967_v41 = vlaneseq }
 0x32d   :  { %vm1969_vm3 = vcmp.lt.s32.totalorder %v1967_v41, 256 }
 0x32f   :  { %v1768_v44 = vpop.f32.mrf.mxu0 }
 0x330   :  { %v1769_v50 = vadd.f32 %v3269_v47, %v1768_v44 }
 0x331   :  { %v1590_v43 = vpop.f32.mrf.mxu3 }
 0x332   :  { %v1591_v46 = vadd.f32 %v3153_v42, %v1590_v43 }
 0x334   :  { %2138 = vmatmul.msk.f32.gmra.mxu0 %vm124_vm1, %v1591_v46 }
 0x33a   :  { %v1771_v48 = vpop.f32.mrf.mxu0 }
 0x33b   :  { %v1772_v49 = vadd.f32 %v3269_v47, %v1771_v48 }
 0x33d   :  { %2143 = vmatpush.xpose.msk.msra.mxu1 %vm124_vm1, %v1772_v49 }
 0x340   :  { %v1593_v51 = vpop.f32.mrf.mxu3 }
 0x341   :  { %v1594_v53 = vadd.f32 %v3153_v42, %v1593_v51  ;;  %2144 = vmatpush.xpose.msk.msra.mxu1 %vm124_vm1, %v1769_v50 }
 0x342   :  { %v3288_v63 = vpop.f32.mrf.mxu0 }
 0x343   :  { %2139 = vmatmul.msk.f32.gmra.mxu0 %vm124_vm1, %v1594_v53  ;;  %v1775_v40 = vadd.f32 %v3269_v47, %v3288_v63 }
 0x345   :  { %2145 = vmatpush.xpose.msk.msra.mxu1 %vm124_vm1, %v1766_v54 }
 0x348   :  { %v1596_v56 = vpop.f32.mrf.mxu3 }
 0x349   :  { %v1597_v58 = vadd.f32 %v3153_v42, %v1596_v56  ;;  %2146 = vmatpush.xpose.msk.msra.mxu1 %vm124_vm1, %v1763_v55 }
 0x34b   :  { %2140 = vmatmul.msk.f32.gmra.mxu0 %vm124_vm1, %v1597_v58  ;;  %v1777_v9 = vpop.f32.mrf.mxu0 }
 0x34c   :  { %v1778_v39 = vadd.f32 %v3269_v47, %v1777_v9 }
 0x34d   :  { %2147 = vmatpush.xpose.msk.msra.mxu1 %vm124_vm1, %v1760_v59 }
 0x351   :  { %2148 = vmatpush.xpose.msk.msra.mxu1 %vm124_vm1, %v1757_v61 }
 0x353   :  { %v1599_v3 = vpop.f32.mrf.mxu3 }
 0x354   :  { %v1600_v4 = vadd.f32 %v3153_v42, %v1599_v3 }
 0x355   :  { %2149 = vmatpush.xpose.msk.msra.mxu1 %vm124_vm1, %v1754_v62 }
 0x356   :  { %2141 = vmatmul.msk.f32.gmra.mxu0 %vm124_vm1, %v1600_v4 }
 0x359   :  { %2150 = vmatpush.xpose.msk.msra.mxu1 %vm124_vm1, %v1751_v5 }
 0x35a   :  { %v1780_v13 = vpop.f32.mrf.mxu0 }
 0x35b   :  { %v1602_v7 = vpop.f32.mrf.mxu3  ;;  %v1781_v0 = vadd.f32 %v3269_v47, %v1780_v13 }
 0x35c   :  { %v1603_v8 = vadd.f32 %v3153_v42, %v1602_v7  ;;  %v1736_v42 = vadd.f32 %v3269_v47, %v3233_v10  ;;  %v1727_v10 = vadd.f32 %v3269_v47, %v3217_v57 }
 0x35d   :  { %2151 = vmatpush.xpose.msk.msra.mxu1 %vm124_vm1, %v1748_v6 }
 0x35e   :  { %2142 = vmatmul.msk.f32.gmra.mxu0 %vm124_vm1, %v1603_v8 }
 0x361   :  { %2152 = vmatpush.xpose.msk.msra.mxu1 %vm124_vm1, %v1745_v11 }
 0x362   :  { %v1783_v16 = vpop.f32.mrf.mxu0 }
 0x363   :  { %v1784_v37 = vadd.f32 %v3269_v47, %v1783_v16 }
 0x365   :  { %2153 = vmatpush.xpose.msk.msra.mxu1 %vm124_vm1, %v1742_v12 }
 0x369   :  { %2154 = vmatpush.xpose.msk.msra.mxu1 %vm124_vm1, %v1739_v14 }
 0x36d   :  { %2155 = vmatpush.xpose.msk.msra.mxu1 %vm124_vm1, %v1736_v42  ;;  %v1786_v18 = vpop.f32.mrf.mxu0 }
 0x36e   :  { %v1787_v36 = vadd.f32 %v3269_v47, %v1786_v18 }
 0x371   :  { %2156 = vmatpush.xpose.msk.msra.mxu1 %vm124_vm1, %v1733_v15 }
 0x375   :  { %2157 = vmatpush.xpose.msk.msra.mxu1 %vm124_vm1, %v1730_v17  ;;  %v1789_v19 = vpop.f32.mrf.mxu0 }
 0x376   :  { %v1790_v34 = vadd.f32 %v3269_v47, %v1789_v19 }
 0x379   :  { %2158 = vmatpush.xpose.msk.msra.mxu1 %vm124_vm1, %v1727_v10 }
 0x37c   :  { %2159 = vmatmul.msk.f32.vlgmr.msra.gmra.mxu1 %vm124_vm1, %v236_v24 }
 0x37e   :  { %v1792_v20 = vpop.f32.mrf.mxu0 }
 0x37f   :  { %v1793_v33 = vadd.f32 %v3269_v47, %v1792_v20 }
 0x38d   :  { %v1795_v21 = vpop.f32.mrf.mxu0 }
 0x38e   :  { %v1796_v31 = vadd.f32 %v3269_v47, %v1795_v21 }
 0x395   :  { %v1798_v60 = vpop.f32.mrf.mxu0 }
 0x396   :  { %v1799_v2 = vadd.f32 %v3269_v47, %v1798_v60 }
 0x3a0   :  { %v1801_v32 = vpop.f32.mrf.mxu0 }
 0x3a1   :  { %v1802_v30 = vadd.f32 %v3269_v47, %v1801_v32 }
 0x3a8   :  { %v1804_v35 = vpop.f32.mrf.mxu0 }
 0x3a9   :  { %v1805_v29 = vadd.f32 %v3269_v47, %v1804_v35 }
 0x3b1   :  { %v1807_v22 = vpop.f32.mrf.mxu0 }
 0x3b2   :  { %v1808_v28 = vadd.f32 %v3269_v47, %v1807_v22 }
 0x3c0   :  { %v1810_v23 = vpop.f32.mrf.mxu0 }
 0x3c1   :  { %v1811_v27 = vadd.f32 %v3269_v47, %v1810_v23 }
 0x3c8   :  { %v1813_v38 = vpop.f32.mrf.mxu0 }
 0x3c9   :  { %v1814_v52 = vadd.f32 %v3269_v47, %v1813_v38 }
 0x3d3   :  { %v1816_v25 = vpop.f32.mrf.mxu0 }
 0x3d4   :  { %v1817_v45 = vadd.f32 %v3269_v47, %v1816_v25 }
 0x3db   :  { %v1819_v26 = vpop.f32.mrf.mxu0 }
 0x3dc   :  { %v1820_v57 = vadd.f32 %v3269_v47, %v1819_v26 }
 0x3de   :  { %2160 = vmatpush.xpose.msk.msra.mxu2 %vm124_vm1, %v1820_v57 }
 0x3e2   :  { %2161 = vmatpush.xpose.msk.msra.mxu2 %vm124_vm1, %v1817_v45 }
 0x3e6   :  { %2162 = vmatpush.xpose.msk.msra.mxu2 %vm124_vm1, %v1814_v52 }
 0x3ea   :  { %2163 = vmatpush.xpose.msk.msra.mxu2 %vm124_vm1, %v1811_v27 }
 0x3ee   :  { %2164 = vmatpush.xpose.msk.msra.mxu2 %vm124_vm1, %v1808_v28 }
 0x3f2   :  { %2165 = vmatpush.xpose.msk.msra.mxu2 %vm124_vm1, %v1805_v29 }
 0x3f6   :  { %2166 = vmatpush.xpose.msk.msra.mxu2 %vm124_vm1, %v1802_v30 }
 0x3f9   :  { %v1938_v46 = vpop.f32.mrf.mxu1 }
 0x3fa   :  { %2167 = vmatpush.xpose.msk.msra.mxu2 %vm124_vm1, %v1799_v2 }
 0x3fe   :  { %2168 = vmatpush.xpose.msk.msra.mxu2 %vm124_vm1, %v1796_v31 }
 0x402   :  { %2169 = vmatpush.xpose.msk.msra.mxu2 %vm124_vm1, %v1793_v33 }
 0x406   :  { %2170 = vmatpush.xpose.msk.msra.mxu2 %vm124_vm1, %v1790_v34 }
 0x40a   :  { %2171 = vmatpush.xpose.msk.msra.mxu2 %vm124_vm1, %v1787_v36 }
 0x40e   :  { %2172 = vmatpush.xpose.msk.msra.mxu2 %vm124_vm1, %v1784_v37 }
 0x412   :  { %2173 = vmatpush.xpose.msk.msra.mxu2 %vm124_vm1, %v1781_v0 }
 0x416   :  { %2174 = vmatpush.xpose.msk.msra.mxu2 %vm124_vm1, %v1778_v39 }
 0x41a   :  { %2175 = vmatpush.xpose.msk.msra.mxu2 %vm124_vm1, %v1775_v40 }
 0x41d   :  { %2176 = vmatmul.msk.f32.vlgmr.msra.gmra.mxu2 %vm124_vm1, %v236_v24 }
 0x4a0   :  { %v1958_v43 = vpop.f32.mrf.mxu2 }
 0x4a1   :  { %v1963_v44 = vrot.slane %v1958_v43, 7 }
 0x4a3   :  { %v1965_v48 = vsel %vm1964_vm2, %v1938_v46, %v1963_v44 }
 0x4a4   :  { %1971 = vst.msk [vmem:[#allocation8] sm:$0x3] %vm1969_vm3, %v1965_v48 }
 0x4a5   :  { %1982 = dma.vmem_to_hbm [thread:$0]  %s1978_s25, 32, %s1980_s26, [#allocation4]  }
 0x4a6   :  { %2481 = dma.done.wait [#allocation4], 32  }
 0x4a7   :  { %2482 = vsyncadd [#allocation4], 4294967264 }
 0x4a8   :  { %1987 = vsyncpa [#allocation3], 1 }
 0x4a9   :  { %1988 = vsyncpa [#allocation6], 1 }
 0x4aa   :  { %1989 = vsyncpa [#allocation4], 1 }

</bundles_post_ra>
